<compile_context>
chip_gen: v5e
topology: v5e:2x2
jax: 0.10.0
libtpu: 0.0.40
codegen_flags: <defaults>
</compile_context>

<pallas_src>
import functools

import jax
import jax.numpy as jnp
from jax.experimental import pallas as pl
from jax.experimental.pallas import tpu as pltpu


_UNROLL_MAX_T = 16   # fully unroll the recurrence up to this many timesteps


def _round_up(x, m):
    return (x + m - 1) // m * m


def _default_batch_tile(batch):
    """Batch rows per grid tile (multiple of 8 sublanes).

    v7x has 2 TensorCores/chip: split the batch so the 'parallel' grid axis
    feeds both.  Single-TC parts (v5e/v6e) prefer one large tile, since extra
    grid steps just re-run the serial T-step recurrence.
    """
    try:
        kind = jax.devices()[0].device_kind.lower()
    except Exception:          # non-TPU tracing fallback
        kind = ""
    n_tc = 2 if ("v7" in kind or "7x" in kind) else 1
    per_tc = -(-batch // n_tc)
    return int(min(256, max(8, _round_up(per_tc, 8))))


def _sentiment_lstm_kernel(
    x_ref,          # (1, T*TB, E) bf16  time-major in tile: row = t*TB + local_b
    w_ih_ref,       # (E, 4Hp)     bf16  input->gates  (gate order i,f,o,g; padded)
    w_hh_ref,       # (Hp, 4Hp)    bf16  hidden->gates
    b_ref,          # (1, 4Hp)     f32   combined bias (b_ih + b_hh)
    bn1_scale_ref,  # (1, Hp)      f32   folded BatchNorm1d(hidden) scale
    bn1_shift_ref,  # (1, Hp)      f32   folded BatchNorm1d(hidden) shift (pad = 0)
    w_fc_ref,       # (1, Hp) if fc_as_reduce else (Hp, O), f32
    b_fc_ref,       # (1, O)       f32
    bn2_scale_ref,  # (1, O)       f32
    bn2_shift_ref,  # (1, O)       f32
    out_ref,        # (1, 1, TB) if fc_as_reduce else (TB, O)
    *scratch,       # (xw VMEM (T*TB, 4Hp) f32,) only when the time loop is rolled
    seq_len: int,
    hidden_pad: int,
    fc_as_reduce: bool,
    unrolled: bool,
):
    T = seq_len
    Hp = hidden_pad
    TB = x_ref.shape[1] // T
    assert unrolled == (len(scratch) == 0)

    # ---- Hoisted input projection: one big MXU matmul per tile, bias folded
    # in with a single broadcast outside the recurrence. ----
    xw = (
        jnp.dot(x_ref[0], w_ih_ref[...], preferred_element_type=jnp.float32)
        + b_ref[...]
    )                                                      # (T*TB, 4Hp) f32

    # Recurrent weight loaded once, resident across the whole loop.
    w_hh = w_hh_ref[...]                                   # (Hp, 4Hp) bf16

    h0 = jnp.zeros((TB, Hp), jnp.float32)
    c0 = jnp.zeros((TB, Hp), jnp.float32)

    def lstm_step(xw_t, h, c):
        # Per-step critical path: one (TB,Hp)x(Hp,4Hp) MXU matmul + gate math.
        gates = xw_t + jnp.dot(h.astype(jnp.bfloat16), w_hh,
                               preferred_element_type=jnp.float32)
        # Gate columns are (i | f | o | g), each 128-lane aligned: sigmoid over
        # the contiguous i/f/o block only, tanh over g only.  All gate math
        # stays in f32 (v5e has no bf16 VPU/EUP).
        sig = jax.nn.sigmoid(gates[:, :3 * Hp])
        g_g = jnp.tanh(gates[:, 3 * Hp:])
        i_g = sig[:, :Hp]
        f_g = sig[:, Hp:2 * Hp]
        o_g = sig[:, 2 * Hp:3 * Hp]
        c_new = f_g * c + i_g * g_g
        h_new = o_g * jnp.tanh(c_new)
        return h_new, c_new

    if unrolled:
        # Short sequences: fully unrolled, static slices of the xw value.
        h, c = h0, c0
        for t in range(T):
            h, c = lstm_step(xw[t * TB:(t + 1) * TB, :], h, c)
    else:
        # Long sequences: rolled loop bounds vreg pressure / code size while
        # unroll=2 keeps per-step scheduling visibility.
        xw_vmem = scratch[0]
        xw_vmem[...] = xw

        def body(t, carry):
            h, c = carry
            start = pl.multiple_of(t * TB, TB)
            return lstm_step(xw_vmem[pl.ds(start, TB), :], h, c)

        h, c = jax.lax.fori_loop(0, T, body, (h0, c0), unroll=2)

    # ---- BatchNorm1d(hidden) (folded affine) + ReLU; Dropout = identity. ----
    h = jnp.maximum(h * bn1_scale_ref[...] + bn1_shift_ref[...], 0.0)

    # ---- Linear(H, O) + BatchNorm1d(O) (folded affine). ----
    if fc_as_reduce:
        # O == 1: produce a lane-dense (1, TB) row (batch along lanes) so the
        # writeback is an unmasked vector store instead of a (TB, 1) column.
        out = jnp.dot(w_fc_ref[...], h.T, preferred_element_type=jnp.float32)
        out = (out + b_fc_ref[...]) * bn2_scale_ref[...] + bn2_shift_ref[...]
        out_ref[...] = out[None, :, :].astype(out_ref.dtype)
    else:
        out = jnp.dot(h, w_fc_ref[...],
                      preferred_element_type=jnp.float32) + b_fc_ref[...]
        out = out * bn2_scale_ref[...] + bn2_shift_ref[...]
        out_ref[...] = out.astype(out_ref.dtype)


@functools.partial(jax.jit, static_argnames=("batch_tile",))
def sentiment_lstm_forward(x, params, *, batch_tile=None):
    """x: (B, T, E) batch_first, like the PyTorch module.  Eval-mode forward."""
    B, T, E = x.shape
    H = params["w_hh"].shape[0]
    O = params["w_fc"].shape[1]
    Hp = _round_up(H, 128)    # 128-lane-aligned gates; padding is exactly neutral

    if batch_tile is None:
        TB = _default_batch_tile(B)
    else:
        TB = _round_up(max(int(batch_tile), 8), 8)   # sublane-divisibility guard
    B_pad = _round_up(B, TB)
    nb = B_pad // TB

    # ---- Plain-JAX glue (one XLA pass): pad batch, cast x to bf16 (MXU
    # operand anyway -> halves HBM->VMEM bytes), relayout each batch tile
    # time-major so the kernel sees one contiguous (T*TB, E) slab.
    xb = x.astype(jnp.bfloat16)
    if B_pad != B:
        xb = jnp.pad(xb, ((0, B_pad - B), (0, 0), (0, 0)))
    x_tiles = (
        xb.reshape(nb, TB, T, E).transpose(0, 2, 1, 3).reshape(nb, T * TB, E)
    )

    # ---- LSTM weights: reorder gate columns (PyTorch i,f,g,o -> i,f,o,g) and
    # zero-pad each gate block to Hp lanes.  (Done per call for simplicity;
    # pre-pad once offline in a real deployment.)
    def reorder_pad_gates(m):                      # (..., 4H) -> (..., 4Hp)
        i, f, g, o = jnp.split(m, 4, axis=-1)
        pad = [(0, 0)] * (m.ndim - 1) + [(0, Hp - H)]
        p = lambda a: jnp.pad(a, pad)
        return jnp.concatenate([p(i), p(f), p(o), p(g)], axis=-1)

    w_ih = reorder_pad_gates(params["w_ih"]).astype(jnp.bfloat16)         # (E, 4Hp)
    w_hh = reorder_pad_gates(
        jnp.pad(params["w_hh"], ((0, Hp - H), (0, 0)))).astype(jnp.bfloat16)  # (Hp, 4Hp)
    bias = reorder_pad_gates(
        (params["b_ih"] + params["b_hh"])[None, :]).astype(jnp.float32)   # (1, 4Hp)

    # ---- Fold BatchNorm (eval running stats) into scale/shift; pad to Hp with
    # shift = 0 so padded hidden columns stay exactly 0 through the epilogue.
    eps = 1e-5
    bn1_scale = params["bn1_gamma"] / jnp.sqrt(params["bn1_var"] + eps)
    bn1_shift = params["bn1_beta"] - params["bn1_mean"] * bn1_scale
    pad_h = lambda v: jnp.pad(v, (0, Hp - H))[None, :].astype(jnp.float32)
    bn1_scale, bn1_shift = pad_h(bn1_scale), pad_h(bn1_shift)             # (1, Hp)

    bn2_scale = (params["bn2_gamma"] / jnp.sqrt(params["bn2_var"] + eps))
    bn2_shift = (params["bn2_beta"] - params["bn2_mean"] * bn2_scale)
    bn2_scale = bn2_scale[None, :].astype(jnp.float32)                    # (1, O)
    bn2_shift = bn2_shift[None, :].astype(jnp.float32)                    # (1, O)

    fc_as_reduce = (O == 1)
    if fc_as_reduce:
        w_fc = jnp.pad(params["w_fc"].reshape(1, H),
                       ((0, 0), (0, Hp - H))).astype(jnp.float32)         # (1, Hp)
    else:
        w_fc = jnp.pad(params["w_fc"],
                       ((0, Hp - H), (0, 0))).astype(jnp.float32)         # (Hp, O)
    b_fc = params["b_fc"][None, :].astype(jnp.float32)                    # (1, O)

    unrolled = T <= _UNROLL_MAX_T
    kernel = functools.partial(
        _sentiment_lstm_kernel, seq_len=T, hidden_pad=Hp,
        fc_as_reduce=fc_as_reduce, unrolled=unrolled)

    # Constant-index (weight / BN) blocks.
    # TODO(synk): on v7x mark these pipeline_mode=pl.Buffered(1) (single
    # buffer) to reclaim the dead second pipeline buffer from the 64 MiB VMEM.
    full = lambda a: pl.BlockSpec(a.shape, lambda b: (0,) * a.ndim)

    if fc_as_reduce:
        # Lane-dense O == 1 output: (nb, 1, TB), batch along lanes.
        out_shape = jax.ShapeDtypeStruct((nb, 1, TB), jnp.float32)
        out_spec = pl.BlockSpec((1, 1, TB), lambda b: (b, 0, 0))
    else:
        out_shape = jax.ShapeDtypeStruct((B_pad, O), jnp.float32)
        out_spec = pl.BlockSpec((TB, O), lambda b: (b, 0))

    # xw stays VMEM-resident across the recurrence; a named scratch slab is
    # only needed for the rolled (long-T) loop.
    # TODO(synk): for very large T*TB on v7x (64 MiB VMEM), T-tile xw with an
    # inner emit_pipeline instead of keeping the whole slab resident.
    scratch_shapes = (
        [] if unrolled else [pltpu.VMEM((T * TB, 4 * Hp), jnp.float32)])

    out = pl.pallas_call(
        kernel,
        out_shape=out_shape,
        grid_spec=pltpu.PrefetchScalarGridSpec(
            num_scalar_prefetch=0,
            grid=(nb,),
            in_specs=[
                pl.BlockSpec((1, T * TB, E), lambda b: (b, 0, 0)),
                full(w_ih), full(w_hh), full(bias),
                full(bn1_scale), full(bn1_shift),
                full(w_fc), full(b_fc), full(bn2_scale), full(bn2_shift),
            ],
            out_specs=out_spec,
            scratch_shapes=scratch_shapes,
        ),
        compiler_params=pltpu.CompilerParams(
            dimension_semantics=("parallel",)),
    )(x_tiles, w_ih, w_hh, bias, bn1_scale, bn1_shift,
      w_fc, b_fc, bn2_scale, bn2_shift)

    if fc_as_reduce:
        return out.reshape(B_pad)[:B].reshape(B, 1)
    return out[:B]


def init_params(key, embedding_dim, hidden_dim, output_dim=1):
    """Deterministic synthetic parameters matching nn.LSTM / BatchNorm1d / Linear.

    PyTorch gate order (i, f, g, o) along the 4H axis; weights stored
    pre-transposed so the forward does x @ W directly.
    """
    ks = jax.random.split(key, 8)
    k_lstm = 1.0 / jnp.sqrt(hidden_dim)
    k_fc = 1.0 / jnp.sqrt(hidden_dim)
    u = lambda k, shape, bound: jax.random.uniform(
        k, shape, jnp.float32, minval=-bound, maxval=bound)
    return {
        # nn.LSTM: weight_ih_l0 (4H,E), weight_hh_l0 (4H,H) -> stored transposed.
        "w_ih": u(ks[0], (embedding_dim, 4 * hidden_dim), k_lstm),
        "w_hh": u(ks[1], (hidden_dim, 4 * hidden_dim), k_lstm),
        "b_ih": u(ks[2], (4 * hidden_dim,), k_lstm),
        "b_hh": u(ks[3], (4 * hidden_dim,), k_lstm),
        # BatchNorm1d(hidden_dim): eval-mode running stats.
        "bn1_gamma": jnp.ones((hidden_dim,), jnp.float32),
        "bn1_beta": jnp.zeros((hidden_dim,), jnp.float32),
        "bn1_mean": jnp.zeros((hidden_dim,), jnp.float32),
        "bn1_var": jnp.ones((hidden_dim,), jnp.float32),
        # nn.Linear(hidden_dim, output_dim): weight (O,H) -> stored transposed.
        "w_fc": u(ks[4], (hidden_dim, output_dim), k_fc),
        "b_fc": u(ks[5], (output_dim,), k_fc),
        # BatchNorm1d(output_dim): eval-mode running stats.
        "bn2_gamma": jnp.ones((output_dim,), jnp.float32),
        "bn2_beta": jnp.zeros((output_dim,), jnp.float32),
        "bn2_mean": jnp.zeros((output_dim,), jnp.float32),
        "bn2_var": jnp.ones((output_dim,), jnp.float32),
    }


def _reference_forward(x, params, mxu_dtype=jnp.float32):
    """Pure-JAX reference of the same eval-mode forward.

    mxu_dtype lets us also build a reference with bf16 matmul operands (f32
    accumulation), matching the kernel's MXU precision.
    """
    B, T, E = x.shape
    H = params["w_hh"].shape[0]
    h = jnp.zeros((B, H), jnp.float32)
    c = jnp.zeros((B, H), jnp.float32)
    bias = params["b_ih"] + params["b_hh"]
    w_ih = params["w_ih"].astype(mxu_dtype)
    w_hh = params["w_hh"].astype(mxu_dtype)
    for t in range(T):
        gates = (
            jnp.dot(x[:, t, :].astype(mxu_dtype), w_ih,
                    preferred_element_type=jnp.float32)
            + jnp.dot(h.astype(mxu_dtype), w_hh,
                      preferred_element_type=jnp.float32)
            + bias
        )
        i = jax.nn.sigmoid(gates[:, 0:H])
        f = jax.nn.sigmoid(gates[:, H:2 * H])
        g = jnp.tanh(gates[:, 2 * H:3 * H])
        o = jax.nn.sigmoid(gates[:, 3 * H:4 * H])
        c = f * c + i * g
        h = o * jnp.tanh(c)
    eps = 1e-5
    h = (h - params["bn1_mean"]) / jnp.sqrt(params["bn1_var"] + eps) \
        * params["bn1_gamma"] + params["bn1_beta"]
    h = jnp.maximum(h, 0.0)
    out = h @ params["w_fc"] + params["b_fc"]
    out = (out - params["bn2_mean"]) / jnp.sqrt(params["bn2_var"] + eps) \
        * params["bn2_gamma"] + params["bn2_beta"]
    return out


if __name__ == "__main__":
    key = jax.random.PRNGKey(0)
    k_x, k_p, k_x2 = jax.random.split(key, 3)

    # Test 1: module-consistent small shapes (unrolled time loop, single tile).
    B, T, E, H, O = 8, 8, 32, 32, 1
    x = jax.random.normal(k_x, (B, T, E), jnp.float32)
    params = init_params(k_p, embedding_dim=E, hidden_dim=H, output_dim=O)
    out = jax.block_until_ready(sentiment_lstm_forward(x, params))
    assert out.shape == (B, O)
    # Tight check vs. a reference with matching MXU precision (bf16 operands,
    # f32 accumulation); loose check vs. the pure-f32 reference.
    ref_bf16 = _reference_forward(x, params, mxu_dtype=jnp.bfloat16)
    ref_f32 = _reference_forward(x, params, mxu_dtype=jnp.float32)
    assert jnp.allclose(out, ref_bf16, atol=5e-3), (out, ref_bf16)
    assert jnp.allclose(out, ref_f32, atol=5e-2), (out, ref_f32)

    # Test 2: rolled time loop (T > unroll cap) + multi-tile "parallel" batch grid.
    B2, T2 = 16, 24
    x2 = jax.random.normal(k_x2, (B2, T2, E), jnp.float32)
    out2 = jax.block_until_ready(
        sentiment_lstm_forward(x2, params, batch_tile=8))
    assert out2.shape == (B2, O)
    ref2 = _reference_forward(x2, params, mxu_dtype=jnp.bfloat16)
    assert jnp.allclose(out2, ref2, atol=1e-2), (out2, ref2)

    print("KERNEL_OK")
</pallas_src>

<mosaic_0001>
module attributes {stable_mosaic.version = 11 : i64} {
  func.func @_sentiment_lstm_kernel(%arg0: i32, %arg1: memref<1x64x32xbf16, #tpu.memory_space<vmem>>, %arg2: memref<32x512xbf16, #tpu.memory_space<vmem>>, %arg3: memref<128x512xbf16, #tpu.memory_space<vmem>>, %arg4: memref<1x512xf32, #tpu.memory_space<vmem>>, %arg5: memref<1x128xf32, #tpu.memory_space<vmem>>, %arg6: memref<1x128xf32, #tpu.memory_space<vmem>>, %arg7: memref<1x128xf32, #tpu.memory_space<vmem>>, %arg8: memref<1x1xf32, #tpu.memory_space<vmem>>, %arg9: memref<1x1xf32, #tpu.memory_space<vmem>>, %arg10: memref<1x1xf32, #tpu.memory_space<vmem>>, %arg11: memref<1x1x8xf32, #tpu.memory_space<vmem>>) attributes {dimension_semantics = [#tpu.dimension_semantics<parallel>], iteration_bounds = array<i64: 1>, scalar_prefetch = 0 : i64, scratch_operands = 0 : i64, tpu.core_type = #tpu.core_type<tc>, window_params = [{transform_indices = @transform_0, window_bounds = array<i64: 1, 64, 32>}, {pipeline_mode = #tpu.pipeline_mode<synchronous>, transform_indices = @transform_1, window_bounds = array<i64: 32, 512>}, {pipeline_mode = #tpu.pipeline_mode<synchronous>, transform_indices = @transform_2, window_bounds = array<i64: 128, 512>}, {pipeline_mode = #tpu.pipeline_mode<synchronous>, transform_indices = @transform_3, window_bounds = array<i64: 1, 512>}, {pipeline_mode = #tpu.pipeline_mode<synchronous>, transform_indices = @transform_4, window_bounds = array<i64: 1, 128>}, {pipeline_mode = #tpu.pipeline_mode<synchronous>, transform_indices = @transform_5, window_bounds = array<i64: 1, 128>}, {pipeline_mode = #tpu.pipeline_mode<synchronous>, transform_indices = @transform_6, window_bounds = array<i64: 1, 128>}, {pipeline_mode = #tpu.pipeline_mode<synchronous>, transform_indices = @transform_7, window_bounds = array<i64: 1, 1>}, {pipeline_mode = #tpu.pipeline_mode<synchronous>, transform_indices = @transform_8, window_bounds = array<i64: 1, 1>}, {pipeline_mode = #tpu.pipeline_mode<synchronous>, transform_indices = @transform_9, window_bounds = array<i64: 1, 1>}, {transform_indices = @transform_10, window_bounds = array<i64: 1, 1, 8>}]} {
    %c0 = arith.constant 0 : index
    %c0_0 = arith.constant 0 : index
    %c0_1 = arith.constant 0 : index
    %0 = vector.load %arg1[%c0, %c0_0, %c0_1] : memref<1x64x32xbf16, #tpu.memory_space<vmem>>, vector<1x64x32xbf16>
    %1 = vector.shape_cast %0 : vector<1x64x32xbf16> to vector<64x32xbf16>
    %c0_2 = arith.constant 0 : index
    %c0_3 = arith.constant 0 : index
    %2 = vector.load %arg2[%c0_2, %c0_3] : memref<32x512xbf16, #tpu.memory_space<vmem>>, vector<32x512xbf16>
    %cst = arith.constant dense<0.000000e+00> : vector<64x512xf32>
    %3 = tpu.matmul %1, %2, %cst {dimension_numbers = #tpu.dot_dimension_numbers<[1], [0], [0], [1], [0, 0, 1, 1], [], []>} : vector<64x32xbf16>, vector<32x512xbf16>, vector<64x512xf32> -> vector<64x512xf32>
    %c0_4 = arith.constant 0 : index
    %c0_5 = arith.constant 0 : index
    %4 = vector.load %arg4[%c0_4, %c0_5] : memref<1x512xf32, #tpu.memory_space<vmem>>, vector<1x512xf32>
    %5 = vector.broadcast %4 : vector<1x512xf32> to vector<64x512xf32>
    %6 = arith.addf %3, %5 : vector<64x512xf32>
    %c0_6 = arith.constant 0 : index
    %c0_7 = arith.constant 0 : index
    %7 = vector.load %arg3[%c0_6, %c0_7] : memref<128x512xbf16, #tpu.memory_space<vmem>>, vector<128x512xbf16>
    %cst_8 = arith.constant 0.000000e+00 : f32
    %8 = vector.broadcast %cst_8 : f32 to vector<8x128xf32>
    %cst_9 = arith.constant 0.000000e+00 : f32
    %9 = vector.broadcast %cst_9 : f32 to vector<8x128xf32>
    %10 = vector.extract_strided_slice %6 {offsets = [0, 0], sizes = [8, 512], strides = [1, 1]} : vector<64x512xf32> to vector<8x512xf32>
    %11 = arith.truncf %8 : vector<8x128xf32> to vector<8x128xbf16>
    %cst_10 = arith.constant dense<0.000000e+00> : vector<8x512xf32>
    %12 = tpu.matmul %11, %7, %cst_10 {dimension_numbers = #tpu.dot_dimension_numbers<[1], [0], [0], [1], [0, 0, 1, 1], [], []>} : vector<8x128xbf16>, vector<128x512xbf16>, vector<8x512xf32> -> vector<8x512xf32>
    %13 = arith.addf %10, %12 : vector<8x512xf32>
    %14 = vector.extract_strided_slice %13 {offsets = [0, 0], sizes = [8, 384], strides = [1, 1]} : vector<8x512xf32> to vector<8x384xf32>
    %15 = arith.negf %14 : vector<8x384xf32>
    %16 = math.exp %15 : vector<8x384xf32>
    %cst_11 = arith.constant 1.000000e+00 : f32
    %17 = vector.broadcast %cst_11 : f32 to vector<8x384xf32>
    %18 = arith.addf %17, %16 : vector<8x384xf32>
    %19 = arith.divf %17, %18 : vector<8x384xf32>
    %20 = vector.extract_strided_slice %13 {offsets = [0, 384], sizes = [8, 128], strides = [1, 1]} : vector<8x512xf32> to vector<8x128xf32>
    %21 = math.tanh %20 : vector<8x128xf32>
    %22 = vector.extract_strided_slice %19 {offsets = [0, 0], sizes = [8, 128], strides = [1, 1]} : vector<8x384xf32> to vector<8x128xf32>
    %23 = vector.extract_strided_slice %19 {offsets = [0, 128], sizes = [8, 128], strides = [1, 1]} : vector<8x384xf32> to vector<8x128xf32>
    %24 = vector.extract_strided_slice %19 {offsets = [0, 256], sizes = [8, 128], strides = [1, 1]} : vector<8x384xf32> to vector<8x128xf32>
    %25 = arith.mulf %23, %9 : vector<8x128xf32>
    %26 = arith.mulf %22, %21 : vector<8x128xf32>
    %27 = arith.addf %25, %26 : vector<8x128xf32>
    %28 = math.tanh %27 : vector<8x128xf32>
    %29 = arith.mulf %24, %28 : vector<8x128xf32>
    %30 = vector.extract_strided_slice %6 {offsets = [8, 0], sizes = [8, 512], strides = [1, 1]} : vector<64x512xf32> to vector<8x512xf32>
    %31 = arith.truncf %29 : vector<8x128xf32> to vector<8x128xbf16>
    %cst_12 = arith.constant dense<0.000000e+00> : vector<8x512xf32>
    %32 = tpu.matmul %31, %7, %cst_12 {dimension_numbers = #tpu.dot_dimension_numbers<[1], [0], [0], [1], [0, 0, 1, 1], [], []>} : vector<8x128xbf16>, vector<128x512xbf16>, vector<8x512xf32> -> vector<8x512xf32>
    %33 = arith.addf %30, %32 : vector<8x512xf32>
    %34 = vector.extract_strided_slice %33 {offsets = [0, 0], sizes = [8, 384], strides = [1, 1]} : vector<8x512xf32> to vector<8x384xf32>
    %35 = arith.negf %34 : vector<8x384xf32>
    %36 = math.exp %35 : vector<8x384xf32>
    %cst_13 = arith.constant 1.000000e+00 : f32
    %37 = vector.broadcast %cst_13 : f32 to vector<8x384xf32>
    %38 = arith.addf %37, %36 : vector<8x384xf32>
    %39 = arith.divf %37, %38 : vector<8x384xf32>
    %40 = vector.extract_strided_slice %33 {offsets = [0, 384], sizes = [8, 128], strides = [1, 1]} : vector<8x512xf32> to vector<8x128xf32>
    %41 = math.tanh %40 : vector<8x128xf32>
    %42 = vector.extract_strided_slice %39 {offsets = [0, 0], sizes = [8, 128], strides = [1, 1]} : vector<8x384xf32> to vector<8x128xf32>
    %43 = vector.extract_strided_slice %39 {offsets = [0, 128], sizes = [8, 128], strides = [1, 1]} : vector<8x384xf32> to vector<8x128xf32>
    %44 = vector.extract_strided_slice %39 {offsets = [0, 256], sizes = [8, 128], strides = [1, 1]} : vector<8x384xf32> to vector<8x128xf32>
    %45 = arith.mulf %43, %27 : vector<8x128xf32>
    %46 = arith.mulf %42, %41 : vector<8x128xf32>
    %47 = arith.addf %45, %46 : vector<8x128xf32>
    %48 = math.tanh %47 : vector<8x128xf32>
    %49 = arith.mulf %44, %48 : vector<8x128xf32>
    %50 = vector.extract_strided_slice %6 {offsets = [16, 0], sizes = [8, 512], strides = [1, 1]} : vector<64x512xf32> to vector<8x512xf32>
    %51 = arith.truncf %49 : vector<8x128xf32> to vector<8x128xbf16>
    %cst_14 = arith.constant dense<0.000000e+00> : vector<8x512xf32>
    %52 = tpu.matmul %51, %7, %cst_14 {dimension_numbers = #tpu.dot_dimension_numbers<[1], [0], [0], [1], [0, 0, 1, 1], [], []>} : vector<8x128xbf16>, vector<128x512xbf16>, vector<8x512xf32> -> vector<8x512xf32>
    %53 = arith.addf %50, %52 : vector<8x512xf32>
    %54 = vector.extract_strided_slice %53 {offsets = [0, 0], sizes = [8, 384], strides = [1, 1]} : vector<8x512xf32> to vector<8x384xf32>
    %55 = arith.negf %54 : vector<8x384xf32>
    %56 = math.exp %55 : vector<8x384xf32>
    %cst_15 = arith.constant 1.000000e+00 : f32
    %57 = vector.broadcast %cst_15 : f32 to vector<8x384xf32>
    %58 = arith.addf %57, %56 : vector<8x384xf32>
    %59 = arith.divf %57, %58 : vector<8x384xf32>
    %60 = vector.extract_strided_slice %53 {offsets = [0, 384], sizes = [8, 128], strides = [1, 1]} : vector<8x512xf32> to vector<8x128xf32>
    %61 = math.tanh %60 : vector<8x128xf32>
    %62 = vector.extract_strided_slice %59 {offsets = [0, 0], sizes = [8, 128], strides = [1, 1]} : vector<8x384xf32> to vector<8x128xf32>
    %63 = vector.extract_strided_slice %59 {offsets = [0, 128], sizes = [8, 128], strides = [1, 1]} : vector<8x384xf32> to vector<8x128xf32>
    %64 = vector.extract_strided_slice %59 {offsets = [0, 256], sizes = [8, 128], strides = [1, 1]} : vector<8x384xf32> to vector<8x128xf32>
    %65 = arith.mulf %63, %47 : vector<8x128xf32>
    %66 = arith.mulf %62, %61 : vector<8x128xf32>
    %67 = arith.addf %65, %66 : vector<8x128xf32>
    %68 = math.tanh %67 : vector<8x128xf32>
    %69 = arith.mulf %64, %68 : vector<8x128xf32>
    %70 = vector.extract_strided_slice %6 {offsets = [24, 0], sizes = [8, 512], strides = [1, 1]} : vector<64x512xf32> to vector<8x512xf32>
    %71 = arith.truncf %69 : vector<8x128xf32> to vector<8x128xbf16>
    %cst_16 = arith.constant dense<0.000000e+00> : vector<8x512xf32>
    %72 = tpu.matmul %71, %7, %cst_16 {dimension_numbers = #tpu.dot_dimension_numbers<[1], [0], [0], [1], [0, 0, 1, 1], [], []>} : vector<8x128xbf16>, vector<128x512xbf16>, vector<8x512xf32> -> vector<8x512xf32>
    %73 = arith.addf %70, %72 : vector<8x512xf32>
    %74 = vector.extract_strided_slice %73 {offsets = [0, 0], sizes = [8, 384], strides = [1, 1]} : vector<8x512xf32> to vector<8x384xf32>
    %75 = arith.negf %74 : vector<8x384xf32>
    %76 = math.exp %75 : vector<8x384xf32>
    %cst_17 = arith.constant 1.000000e+00 : f32
    %77 = vector.broadcast %cst_17 : f32 to vector<8x384xf32>
    %78 = arith.addf %77, %76 : vector<8x384xf32>
    %79 = arith.divf %77, %78 : vector<8x384xf32>
    %80 = vector.extract_strided_slice %73 {offsets = [0, 384], sizes = [8, 128], strides = [1, 1]} : vector<8x512xf32> to vector<8x128xf32>
    %81 = math.tanh %80 : vector<8x128xf32>
    %82 = vector.extract_strided_slice %79 {offsets = [0, 0], sizes = [8, 128], strides = [1, 1]} : vector<8x384xf32> to vector<8x128xf32>
    %83 = vector.extract_strided_slice %79 {offsets = [0, 128], sizes = [8, 128], strides = [1, 1]} : vector<8x384xf32> to vector<8x128xf32>
    %84 = vector.extract_strided_slice %79 {offsets = [0, 256], sizes = [8, 128], strides = [1, 1]} : vector<8x384xf32> to vector<8x128xf32>
    %85 = arith.mulf %83, %67 : vector<8x128xf32>
    %86 = arith.mulf %82, %81 : vector<8x128xf32>
    %87 = arith.addf %85, %86 : vector<8x128xf32>
    %88 = math.tanh %87 : vector<8x128xf32>
    %89 = arith.mulf %84, %88 : vector<8x128xf32>
    %90 = vector.extract_strided_slice %6 {offsets = [32, 0], sizes = [8, 512], strides = [1, 1]} : vector<64x512xf32> to vector<8x512xf32>
    %91 = arith.truncf %89 : vector<8x128xf32> to vector<8x128xbf16>
    %cst_18 = arith.constant dense<0.000000e+00> : vector<8x512xf32>
    %92 = tpu.matmul %91, %7, %cst_18 {dimension_numbers = #tpu.dot_dimension_numbers<[1], [0], [0], [1], [0, 0, 1, 1], [], []>} : vector<8x128xbf16>, vector<128x512xbf16>, vector<8x512xf32> -> vector<8x512xf32>
    %93 = arith.addf %90, %92 : vector<8x512xf32>
    %94 = vector.extract_strided_slice %93 {offsets = [0, 0], sizes = [8, 384], strides = [1, 1]} : vector<8x512xf32> to vector<8x384xf32>
    %95 = arith.negf %94 : vector<8x384xf32>
    %96 = math.exp %95 : vector<8x384xf32>
    %cst_19 = arith.constant 1.000000e+00 : f32
    %97 = vector.broadcast %cst_19 : f32 to vector<8x384xf32>
    %98 = arith.addf %97, %96 : vector<8x384xf32>
    %99 = arith.divf %97, %98 : vector<8x384xf32>
    %100 = vector.extract_strided_slice %93 {offsets = [0, 384], sizes = [8, 128], strides = [1, 1]} : vector<8x512xf32> to vector<8x128xf32>
    %101 = math.tanh %100 : vector<8x128xf32>
    %102 = vector.extract_strided_slice %99 {offsets = [0, 0], sizes = [8, 128], strides = [1, 1]} : vector<8x384xf32> to vector<8x128xf32>
    %103 = vector.extract_strided_slice %99 {offsets = [0, 128], sizes = [8, 128], strides = [1, 1]} : vector<8x384xf32> to vector<8x128xf32>
    %104 = vector.extract_strided_slice %99 {offsets = [0, 256], sizes = [8, 128], strides = [1, 1]} : vector<8x384xf32> to vector<8x128xf32>
    %105 = arith.mulf %103, %87 : vector<8x128xf32>
    %106 = arith.mulf %102, %101 : vector<8x128xf32>
    %107 = arith.addf %105, %106 : vector<8x128xf32>
    %108 = math.tanh %107 : vector<8x128xf32>
    %109 = arith.mulf %104, %108 : vector<8x128xf32>
    %110 = vector.extract_strided_slice %6 {offsets = [40, 0], sizes = [8, 512], strides = [1, 1]} : vector<64x512xf32> to vector<8x512xf32>
    %111 = arith.truncf %109 : vector<8x128xf32> to vector<8x128xbf16>
    %cst_20 = arith.constant dense<0.000000e+00> : vector<8x512xf32>
    %112 = tpu.matmul %111, %7, %cst_20 {dimension_numbers = #tpu.dot_dimension_numbers<[1], [0], [0], [1], [0, 0, 1, 1], [], []>} : vector<8x128xbf16>, vector<128x512xbf16>, vector<8x512xf32> -> vector<8x512xf32>
    %113 = arith.addf %110, %112 : vector<8x512xf32>
    %114 = vector.extract_strided_slice %113 {offsets = [0, 0], sizes = [8, 384], strides = [1, 1]} : vector<8x512xf32> to vector<8x384xf32>
    %115 = arith.negf %114 : vector<8x384xf32>
    %116 = math.exp %115 : vector<8x384xf32>
    %cst_21 = arith.constant 1.000000e+00 : f32
    %117 = vector.broadcast %cst_21 : f32 to vector<8x384xf32>
    %118 = arith.addf %117, %116 : vector<8x384xf32>
    %119 = arith.divf %117, %118 : vector<8x384xf32>
    %120 = vector.extract_strided_slice %113 {offsets = [0, 384], sizes = [8, 128], strides = [1, 1]} : vector<8x512xf32> to vector<8x128xf32>
    %121 = math.tanh %120 : vector<8x128xf32>
    %122 = vector.extract_strided_slice %119 {offsets = [0, 0], sizes = [8, 128], strides = [1, 1]} : vector<8x384xf32> to vector<8x128xf32>
    %123 = vector.extract_strided_slice %119 {offsets = [0, 128], sizes = [8, 128], strides = [1, 1]} : vector<8x384xf32> to vector<8x128xf32>
    %124 = vector.extract_strided_slice %119 {offsets = [0, 256], sizes = [8, 128], strides = [1, 1]} : vector<8x384xf32> to vector<8x128xf32>
    %125 = arith.mulf %123, %107 : vector<8x128xf32>
    %126 = arith.mulf %122, %121 : vector<8x128xf32>
    %127 = arith.addf %125, %126 : vector<8x128xf32>
    %128 = math.tanh %127 : vector<8x128xf32>
    %129 = arith.mulf %124, %128 : vector<8x128xf32>
    %130 = vector.extract_strided_slice %6 {offsets = [48, 0], sizes = [8, 512], strides = [1, 1]} : vector<64x512xf32> to vector<8x512xf32>
    %131 = arith.truncf %129 : vector<8x128xf32> to vector<8x128xbf16>
    %cst_22 = arith.constant dense<0.000000e+00> : vector<8x512xf32>
    %132 = tpu.matmul %131, %7, %cst_22 {dimension_numbers = #tpu.dot_dimension_numbers<[1], [0], [0], [1], [0, 0, 1, 1], [], []>} : vector<8x128xbf16>, vector<128x512xbf16>, vector<8x512xf32> -> vector<8x512xf32>
    %133 = arith.addf %130, %132 : vector<8x512xf32>
    %134 = vector.extract_strided_slice %133 {offsets = [0, 0], sizes = [8, 384], strides = [1, 1]} : vector<8x512xf32> to vector<8x384xf32>
    %135 = arith.negf %134 : vector<8x384xf32>
    %136 = math.exp %135 : vector<8x384xf32>
    %cst_23 = arith.constant 1.000000e+00 : f32
    %137 = vector.broadcast %cst_23 : f32 to vector<8x384xf32>
    %138 = arith.addf %137, %136 : vector<8x384xf32>
    %139 = arith.divf %137, %138 : vector<8x384xf32>
    %140 = vector.extract_strided_slice %133 {offsets = [0, 384], sizes = [8, 128], strides = [1, 1]} : vector<8x512xf32> to vector<8x128xf32>
    %141 = math.tanh %140 : vector<8x128xf32>
    %142 = vector.extract_strided_slice %139 {offsets = [0, 0], sizes = [8, 128], strides = [1, 1]} : vector<8x384xf32> to vector<8x128xf32>
    %143 = vector.extract_strided_slice %139 {offsets = [0, 128], sizes = [8, 128], strides = [1, 1]} : vector<8x384xf32> to vector<8x128xf32>
    %144 = vector.extract_strided_slice %139 {offsets = [0, 256], sizes = [8, 128], strides = [1, 1]} : vector<8x384xf32> to vector<8x128xf32>
    %145 = arith.mulf %143, %127 : vector<8x128xf32>
    %146 = arith.mulf %142, %141 : vector<8x128xf32>
    %147 = arith.addf %145, %146 : vector<8x128xf32>
    %148 = math.tanh %147 : vector<8x128xf32>
    %149 = arith.mulf %144, %148 : vector<8x128xf32>
    %150 = vector.extract_strided_slice %6 {offsets = [56, 0], sizes = [8, 512], strides = [1, 1]} : vector<64x512xf32> to vector<8x512xf32>
    %151 = arith.truncf %149 : vector<8x128xf32> to vector<8x128xbf16>
    %cst_24 = arith.constant dense<0.000000e+00> : vector<8x512xf32>
    %152 = tpu.matmul %151, %7, %cst_24 {dimension_numbers = #tpu.dot_dimension_numbers<[1], [0], [0], [1], [0, 0, 1, 1], [], []>} : vector<8x128xbf16>, vector<128x512xbf16>, vector<8x512xf32> -> vector<8x512xf32>
    %153 = arith.addf %150, %152 : vector<8x512xf32>
    %154 = vector.extract_strided_slice %153 {offsets = [0, 0], sizes = [8, 384], strides = [1, 1]} : vector<8x512xf32> to vector<8x384xf32>
    %155 = arith.negf %154 : vector<8x384xf32>
    %156 = math.exp %155 : vector<8x384xf32>
    %cst_25 = arith.constant 1.000000e+00 : f32
    %157 = vector.broadcast %cst_25 : f32 to vector<8x384xf32>
    %158 = arith.addf %157, %156 : vector<8x384xf32>
    %159 = arith.divf %157, %158 : vector<8x384xf32>
    %160 = vector.extract_strided_slice %153 {offsets = [0, 384], sizes = [8, 128], strides = [1, 1]} : vector<8x512xf32> to vector<8x128xf32>
    %161 = math.tanh %160 : vector<8x128xf32>
    %162 = vector.extract_strided_slice %159 {offsets = [0, 0], sizes = [8, 128], strides = [1, 1]} : vector<8x384xf32> to vector<8x128xf32>
    %163 = vector.extract_strided_slice %159 {offsets = [0, 128], sizes = [8, 128], strides = [1, 1]} : vector<8x384xf32> to vector<8x128xf32>
    %164 = vector.extract_strided_slice %159 {offsets = [0, 256], sizes = [8, 128], strides = [1, 1]} : vector<8x384xf32> to vector<8x128xf32>
    %165 = arith.mulf %163, %147 : vector<8x128xf32>
    %166 = arith.mulf %162, %161 : vector<8x128xf32>
    %167 = arith.addf %165, %166 : vector<8x128xf32>
    %168 = math.tanh %167 : vector<8x128xf32>
    %169 = arith.mulf %164, %168 : vector<8x128xf32>
    %c0_26 = arith.constant 0 : index
    %c0_27 = arith.constant 0 : index
    %170 = vector.load %arg5[%c0_26, %c0_27] : memref<1x128xf32, #tpu.memory_space<vmem>>, vector<1x128xf32>
    %171 = vector.broadcast %170 : vector<1x128xf32> to vector<8x128xf32>
    %172 = arith.mulf %169, %171 : vector<8x128xf32>
    %c0_28 = arith.constant 0 : index
    %c0_29 = arith.constant 0 : index
    %173 = vector.load %arg6[%c0_28, %c0_29] : memref<1x128xf32, #tpu.memory_space<vmem>>, vector<1x128xf32>
    %174 = vector.broadcast %173 : vector<1x128xf32> to vector<8x128xf32>
    %175 = arith.addf %172, %174 : vector<8x128xf32>
    %cst_30 = arith.constant 0.000000e+00 : f32
    %176 = vector.broadcast %cst_30 : f32 to vector<8x128xf32>
    %177 = arith.maximumf %175, %176 : vector<8x128xf32>
    %c0_31 = arith.constant 0 : index
    %c0_32 = arith.constant 0 : index
    %178 = vector.load %arg7[%c0_31, %c0_32] : memref<1x128xf32, #tpu.memory_space<vmem>>, vector<1x128xf32>
    %179 = tpu.transpose %177, [1, 0] : vector<8x128xf32> -> vector<128x8xf32>
    %cst_33 = arith.constant dense<0.000000e+00> : vector<1x8xf32>
    %180 = tpu.matmul %178, %179, %cst_33 {dimension_numbers = #tpu.dot_dimension_numbers<[1], [0], [0], [1], [0, 0, 1, 1], [], []>} : vector<1x128xf32>, vector<128x8xf32>, vector<1x8xf32> -> vector<1x8xf32>
    %c0_34 = arith.constant 0 : index
    %c0_35 = arith.constant 0 : index
    %181 = vector.load %arg8[%c0_34, %c0_35] : memref<1x1xf32, #tpu.memory_space<vmem>>, vector<1x1xf32>
    %182 = vector.broadcast %181 : vector<1x1xf32> to vector<1x8xf32>
    %183 = arith.addf %180, %182 : vector<1x8xf32>
    %c0_36 = arith.constant 0 : index
    %c0_37 = arith.constant 0 : index
    %184 = vector.load %arg9[%c0_36, %c0_37] : memref<1x1xf32, #tpu.memory_space<vmem>>, vector<1x1xf32>
    %185 = vector.broadcast %184 : vector<1x1xf32> to vector<1x8xf32>
    %186 = arith.mulf %183, %185 : vector<1x8xf32>
    %c0_38 = arith.constant 0 : index
    %c0_39 = arith.constant 0 : index
    %187 = vector.load %arg10[%c0_38, %c0_39] : memref<1x1xf32, #tpu.memory_space<vmem>>, vector<1x1xf32>
    %188 = vector.broadcast %187 : vector<1x1xf32> to vector<1x8xf32>
    %189 = arith.addf %186, %188 : vector<1x8xf32>
    %190 = vector.shape_cast %189 : vector<1x8xf32> to vector<1x1x8xf32>
    %c0_40 = arith.constant 0 : index
    %c0_41 = arith.constant 0 : index
    %c0_42 = arith.constant 0 : index
    %191 = vector.load %arg11[%c0_40, %c0_41, %c0_42] : memref<1x1x8xf32, #tpu.memory_space<vmem>>, vector<1x1x8xf32>
    tpu.vector_store %arg11[%c0_40, %c0_41, %c0_42], %190 {strides = array<i32>} : memref<1x1x8xf32, #tpu.memory_space<vmem>>, vector<1x1x8xf32>,
    return
  }
  func.func @transform_0(%arg0: i32) -> (i32, i32, i32) {
    %c0_i32 = arith.constant 0 : i32
    %c0_i32_0 = arith.constant 0 : i32
    %c0_i32_1 = arith.constant 0 : i32
    return %arg0, %c0_i32, %c0_i32_0 : i32, i32, i32
  }
  func.func @transform_1(%arg0: i32) -> (i32, i32) {
    %c0_i32 = arith.constant 0 : i32
    %c0_i32_0 = arith.constant 0 : i32
    %c0_i32_1 = arith.constant 0 : i32
    return %c0_i32, %c0_i32_0 : i32, i32
  }
  func.func @transform_2(%arg0: i32) -> (i32, i32) {
    %c0_i32 = arith.constant 0 : i32
    %c0_i32_0 = arith.constant 0 : i32
    %c0_i32_1 = arith.constant 0 : i32
    return %c0_i32, %c0_i32_0 : i32, i32
  }
  func.func @transform_3(%arg0: i32) -> (i32, i32) {
    %c0_i32 = arith.constant 0 : i32
    %c0_i32_0 = arith.constant 0 : i32
    %c0_i32_1 = arith.constant 0 : i32
    return %c0_i32, %c0_i32_0 : i32, i32
  }
  func.func @transform_4(%arg0: i32) -> (i32, i32) {
    %c0_i32 = arith.constant 0 : i32
    %c0_i32_0 = arith.constant 0 : i32
    %c0_i32_1 = arith.constant 0 : i32
    return %c0_i32, %c0_i32_0 : i32, i32
  }
  func.func @transform_5(%arg0: i32) -> (i32, i32) {
    %c0_i32 = arith.constant 0 : i32
    %c0_i32_0 = arith.constant 0 : i32
    %c0_i32_1 = arith.constant 0 : i32
    return %c0_i32, %c0_i32_0 : i32, i32
  }
  func.func @transform_6(%arg0: i32) -> (i32, i32) {
    %c0_i32 = arith.constant 0 : i32
    %c0_i32_0 = arith.constant 0 : i32
    %c0_i32_1 = arith.constant 0 : i32
    return %c0_i32, %c0_i32_0 : i32, i32
  }
  func.func @transform_7(%arg0: i32) -> (i32, i32) {
    %c0_i32 = arith.constant 0 : i32
    %c0_i32_0 = arith.constant 0 : i32
    %c0_i32_1 = arith.constant 0 : i32
    return %c0_i32, %c0_i32_0 : i32, i32
  }
  func.func @transform_8(%arg0: i32) -> (i32, i32) {
    %c0_i32 = arith.constant 0 : i32
    %c0_i32_0 = arith.constant 0 : i32
    %c0_i32_1 = arith.constant 0 : i32
    return %c0_i32, %c0_i32_0 : i32, i32
  }
  func.func @transform_9(%arg0: i32) -> (i32, i32) {
    %c0_i32 = arith.constant 0 : i32
    %c0_i32_0 = arith.constant 0 : i32
    %c0_i32_1 = arith.constant 0 : i32
    return %c0_i32, %c0_i32_0 : i32, i32
  }
  func.func @transform_10(%arg0: i32) -> (i32, i32, i32) {
    %c0_i32 = arith.constant 0 : i32
    %c0_i32_0 = arith.constant 0 : i32
    %c0_i32_1 = arith.constant 0 : i32
    return %arg0, %c0_i32, %c0_i32_0 : i32, i32, i32
  }
}

</mosaic_0001>

<bundles_post_ra>
// kernel: sentiment_lstm_forward.1
= control target key start
LH: loop header
LB: loop body
LE: loop exit
PB: predicated region body
PF: predicated region fallthrough
CT: control target
= control target key end

     0   :  { %s2699_s0 = inlined_call_operand.vmem [shape: bf16[1,64,32], index: 0, kind: input, shape index: {}]   ;;  %s2700_s1 = inlined_call_operand.vmem [shape: bf16[32,512], index: 1, kind: input, shape index: {}]   ;;  %s2701_s2 = inlined_call_operand.vmem [shape: bf16[128,512], index: 2, kind: input, shape index: {}]   ;;  %s2702_s3 = inlined_call_operand.vmem [shape: f32[1,512], index: 3, kind: input, shape index: {}]   ;;  %s2703_s4 = inlined_call_operand.vmem [shape: f32[1,128], index: 4, kind: input, shape index: {}]   ;;  %s2704_s5 = inlined_call_operand.vmem [shape: f32[1,128], index: 5, kind: input, shape index: {}]   ;;  %s2705_s6 = inlined_call_operand.vmem [shape: f32[1,128], index: 6, kind: input, shape index: {}]   ;;  %s2706_s7 = inlined_call_operand.<no memory space> [shape: f32[1,1], index: 7, kind: input, shape index: {}]   ;;  %s2707_s10 = inlined_call_operand.hbm [shape: f32[1,1,8], index: 10, kind: output, shape index: {}]   ;;  %s2708_s8 = inlined_call_operand.<no memory space> [shape: f32[1,1], index: 8, kind: input, shape index: {}]   ;;  %s2709_s9 = inlined_call_operand.<no memory space> [shape: f32[1,1], index: 9, kind: input, shape index: {}]  }
   0x1   :  { %v15_v0 = vstv %s2706_s7  ;;  %v17_v1 = vstv %s2708_s8  ;;  %v19_v2 = vstv %s2709_s9 }
   0x2   :  { %16 = vst [vmem:[#allocation2] sm:$0x1] %v15_v0 }
   0x3   :  { %18 = vst [vmem:[#allocation3] sm:$0x1] %v17_v1 }
   0x4   :  { %20 = vst [vmem:[#allocation4] sm:$0x1] %v19_v2 }
   0x5   :  { %v1516_v3 = vld [vmem:[%s2700_s1 + $0x20] sm:$0xf]  ;;  %v1708_v4 = vld [vmem:[%s2700_s1 + $0x2c] sm:$0xf0]  ;;  %v1706_v5 = vld [vmem:[%s2700_s1 + $0x24] sm:$0xf] }
   0x6   :  { %v1517_v6 = vor.u32 %v1708_v4, %v1516_v3  ;;  %v1518_v7 = vld [vmem:[%s2700_s1 + $0x30] sm:$0xf0]  ;;  %v1524_v8 = vld [vmem:[%s2700_s1 + $0x28] sm:$0xf]  ;;  %v1709_v9 = vld [vmem:[%s2700_s1 + $0x34] sm:$0xf0] }
   0x7   :  { %v1521_v10 = vor.u32 %v1706_v5, %v1518_v7  ;;  %v1525_v11 = vor.u32 %v1709_v9, %v1524_v8  ;;  %v1707_v12 = vld [vmem:[%s2700_s1 + $0x2c] sm:$0xf]  ;;  %v1526_v13 = vld [vmem:[%s2700_s1 + $0x38] sm:$0xf0]  ;;  %v1500_v14 = vld [vmem:[%s2700_s1] sm:$0xf] }
   0x8   :  { %148 = vmatpush.bf16.msra.mxu0 %v1517_v6  ;;  %v1529_v15 = vor.u32 %v1707_v12, %v1526_v13  ;;  %v1704_v16 = vld [vmem:[%s2700_s1 + $0xc] sm:$0xf0]  ;;  %v1702_v17 = vld [vmem:[%s2700_s1 + $0x4] sm:$0xf]  ;;  %v1502_v18 = vld [vmem:[%s2700_s1 + $0x10] sm:$0xf0] }
   0x9   :  { %177 = vmatpush.bf16.msra.mxu1 %v1521_v10  ;;  %206 = vmatpush.bf16.msra.mxu2 %v1525_v11  ;;  %v1501_v19 = vor.u32 %v1704_v16, %v1500_v14  ;;  %v1505_v20 = vor.u32 %v1702_v17, %v1502_v18  ;;  %v1508_v21 = vld [vmem:[%s2700_s1 + $0x8] sm:$0xf]  ;;  %v1705_v22 = vld [vmem:[%s2700_s1 + $0x14] sm:$0xf0]  ;;  %v1703_v23 = vld [vmem:[%s2700_s1 + $0xc] sm:$0xf] }
   0xa   :  { %235 = vmatpush.bf16.msra.mxu3 %v1529_v15  ;;  %v1509_v24 = vor.u32 %v1705_v22, %v1508_v21  ;;  %v1510_v25 = vld [vmem:[%s2700_s1 + $0x18] sm:$0xf0]  ;;  %v1698_v26 = vld [vmem:[%s2699_s0] sm:$0xff]  ;;  %v1740_v29 = vld [vmem:[%s2701_s2 + $0xec] sm:$0xf0]  ;;  %vm129_vm0 = vcmask 261120  }
   0xb   :  { %v1660_v27 = vld [vmem:[%s2701_s2 + $0xe0] sm:$0xf]  ;;  %v1513_v28 = vor.u32 %v1703_v23, %v1510_v25  ;;  %v1738_v30 = vld [vmem:[%s2701_s2 + $0xe4] sm:$0xf]  ;;  %v1662_v31 = vld [vmem:[%s2701_s2 + $0xf0] sm:$0xf0] }
   0xc   :  { %149 = vmatpush.bf16.msra.mxu0 %v1501_v19  ;;  %v2031_v32 = vor.u32 %v1740_v29, %v1660_v27  ;;  %v2033_v33 = vor.u32 %v1738_v30, %v1662_v31  ;;  %v1668_v34 = vld [vmem:[%s2701_s2 + $0xe8] sm:$0xf]  ;;  %v1741_v35 = vld [vmem:[%s2701_s2 + $0xf4] sm:$0xf0]  ;;  %v1644_v37 = vld [vmem:[%s2701_s2 + $0xc0] sm:$0xf] }
   0xd   :  { %178 = vmatpush.bf16.msra.mxu1 %v1505_v20  ;;  %207 = vmatpush.bf16.msra.mxu2 %v1509_v24  ;;  %v2041_v36 = vor.u32 %v1741_v35, %v1668_v34  ;;  %v1736_v38 = vld [vmem:[%s2701_s2 + $0xcc] sm:$0xf0]  ;;  %v1734_v39 = vld [vmem:[%s2701_s2 + $0xc4] sm:$0xf]  ;;  %v1646_v41 = vld [vmem:[%s2701_s2 + $0xd0] sm:$0xf0] }
   0xe   :  { %236 = vmatpush.bf16.msra.mxu3 %v1513_v28  ;;  %v2053_v40 = vor.u32 %v1736_v38, %v1644_v37  ;;  %v1652_v42 = vld [vmem:[%s2701_s2 + $0xc8] sm:$0xf]  ;;  %v1737_v43 = vld [vmem:[%s2701_s2 + $0xd4] sm:$0xf0]  ;;  %v2066_v44 = vor.u32 %v1734_v39, %v1646_v41  ;;  %v1739_v45 = vld [vmem:[%s2701_s2 + $0xec] sm:$0xf] }
   0xf   :  { %1530 = vmatmul.msk.bf16.vlgmr.msra.gmra.mxu0 %vm129_vm0, %v1698_v26  ;;  %v1670_v46 = vld [vmem:[%s2701_s2 + $0xf8] sm:$0xf0]  ;;  %v1628_v47 = vld [vmem:[%s2701_s2 + $0xa0] sm:$0xf]  ;;  %v1732_v49 = vld [vmem:[%s2701_s2 + $0xac] sm:$0xf0]  ;;  %v2092_v52 = vor.u32 %v1737_v43, %v1652_v42 }
  0x10   :  { %450 = vmatpush.bf16.msrb.mxu0 %v2031_v32  ;;  %1534 = vmatmul.msk.bf16.vlgmr.msra.gmra.mxu1 %vm129_vm0, %v1698_v26  ;;  %v2079_v48 = vor.u32 %v1739_v45, %v1670_v46  ;;  %v1730_v50 = vld [vmem:[%s2701_s2 + $0xa4] sm:$0xf]  ;;  %v1630_v51 = vld [vmem:[%s2701_s2 + $0xb0] sm:$0xf0]  ;;  %v1636_v53 = vld [vmem:[%s2701_s2 + $0xa8] sm:$0xf]  ;;  %v2099_v54 = vor.u32 %v1732_v49, %v1628_v47 }
  0x11   :  { %463 = vmatpush.bf16.msrb.mxu1 %v2033_v33  ;;  %1538 = vmatmul.msk.bf16.vlgmr.msra.gmra.mxu2 %vm129_vm0, %v1698_v26  ;;  %v1733_v55 = vld [vmem:[%s2701_s2 + $0xb4] sm:$0xf0]  ;;  %v1735_v56 = vld [vmem:[%s2701_s2 + $0xcc] sm:$0xf]  ;;  %v1654_v57 = vld [vmem:[%s2701_s2 + $0xd8] sm:$0xf0]  ;;  %v2111_v58 = vor.u32 %v1730_v50, %v1630_v51 }
  0x12   :  { %1542 = vmatmul.msk.bf16.vlgmr.msra.gmra.mxu3 %vm129_vm0, %v1698_v26  ;;  %476 = vmatpush.bf16.msrb.mxu2 %v2041_v36  ;;  %v2113_v59 = vor.u32 %v1735_v56, %v1654_v57  ;;  %v1612_v60 = vld [vmem:[%s2701_s2 + $0x80] sm:$0xf]  ;;  %v1728_v61 = vld [vmem:[%s2701_s2 + $0x8c] sm:$0xf0]  ;;  %v1726_v62 = vld [vmem:[%s2701_s2 + $0x84] sm:$0xf]  ;;  %v2134_v2 = vor.u32 %v1733_v55, %v1636_v53 }
  0x13   :  { %489 = vmatpush.bf16.msrb.mxu3 %v2079_v48  ;;  %v1614_v63 = vld [vmem:[%s2701_s2 + $0x90] sm:$0xf0]  ;;  %v1731_v0 = vld [vmem:[%s2701_s2 + $0xac] sm:$0xf]  ;;  %v1638_v1 = vld [vmem:[%s2701_s2 + $0xb8] sm:$0xf0]  ;;  %v2144_v5 = vor.u32 %v1728_v61, %v1612_v60 }
  0x14   :  { %451 = vmatpush.bf16.msrb.mxu0 %v2053_v40  ;;  %v1620_v3 = vld [vmem:[%s2701_s2 + $0x88] sm:$0xf]  ;;  %v1729_v4 = vld [vmem:[%s2701_s2 + $0x94] sm:$0xf0]  ;;  %v2146_v6 = vor.u32 %v1731_v0, %v1638_v1  ;;  %v1596_v7 = vld [vmem:[%s2701_s2 + $0x60] sm:$0xf]  ;;  %v2158_v10 = vor.u32 %v1726_v62, %v1614_v63 }
  0x15   :  { %464 = vmatpush.bf16.msrb.mxu1 %v2066_v44  ;;  %v1724_v8 = vld [vmem:[%s2701_s2 + $0x6c] sm:$0xf0]  ;;  %v1722_v9 = vld [vmem:[%s2701_s2 + $0x64] sm:$0xf]  ;;  %v1727_v11 = vld [vmem:[%s2701_s2 + $0x8c] sm:$0xf] }
  0x16   :  { %477 = vmatpush.bf16.msrb.mxu2 %v2092_v52  ;;  %v1622_v12 = vld [vmem:[%s2701_s2 + $0x98] sm:$0xf0]  ;;  %v1598_v13 = vld [vmem:[%s2701_s2 + $0x70] sm:$0xf0] }
  0x17   :  { %490 = vmatpush.bf16.msrb.mxu3 %v2113_v59 }
  0x18   :  { %452 = vmatpush.bf16.msrb.mxu0 %v2099_v54 }
  0x19   :  { %465 = vmatpush.bf16.msrb.mxu1 %v2111_v58 }
  0x1a   :  { %21 = vsyncpa [#allocation6], 0  ;;  %478 = vmatpush.bf16.msrb.mxu2 %v2134_v2  ;;  %v2170_v14 = vor.u32 %v1729_v4, %v1620_v3  ;;  %v2174_v15 = vor.u32 %v1724_v8, %v1596_v7  ;;  %v2176_v16 = vor.u32 %v1727_v11, %v1622_v12  ;;  %v1699_v17 = vld [vmem:[%s2699_s0 + $0x8] sm:$0xff]  ;;  %v2182_v18 = vor.u32 %v1722_v9, %v1598_v13  ;;  %v1725_v20 = vld [vmem:[%s2701_s2 + $0x74] sm:$0xf0]  ;;  %s1473_s9 = sshll.u32 %s2707_s10, 4  ;;  %s1474_s9 = int_to_ptr.hbm [resolvable:$true] %s1473_s9 }
  0x1b   :  { %491 = vmatpush.bf16.msrb.mxu3 %v2146_v6  ;;  %v1604_v19 = vld [vmem:[%s2701_s2 + $0x68] sm:$0xf]  ;;  %v1723_v21 = vld [vmem:[%s2701_s2 + $0x6c] sm:$0xf]  ;;  %v1606_v23 = vld [vmem:[%s2701_s2 + $0x78] sm:$0xf0] }
  0x1c   :  { %453 = vmatpush.bf16.msrb.mxu0 %v2144_v5  ;;  %v2200_v22 = vor.u32 %v1725_v20, %v1604_v19  ;;  %v2206_v24 = vor.u32 %v1723_v21, %v1606_v23  ;;  %v1580_v25 = vld [vmem:[%s2701_s2 + $0x40] sm:$0xf]  ;;  %v1720_v26 = vld [vmem:[%s2701_s2 + $0x4c] sm:$0xf0]  ;;  %v1718_v27 = vld [vmem:[%s2701_s2 + $0x44] sm:$0xf] }
  0x1d   :  { %466 = vmatpush.bf16.msrb.mxu1 %v2158_v10  ;;  %v2218_v28 = vor.u32 %v1720_v26, %v1580_v25  ;;  %v1582_v29 = vld [vmem:[%s2701_s2 + $0x50] sm:$0xf0]  ;;  %v1588_v30 = vld [vmem:[%s2701_s2 + $0x48] sm:$0xf]  ;;  %v1721_v31 = vld [vmem:[%s2701_s2 + $0x54] sm:$0xf0] }
  0x1e   :  { %479 = vmatpush.bf16.msrb.mxu2 %v2170_v14  ;;  %v2230_v34 = vor.u32 %v1718_v27, %v1582_v29  ;;  %v2232_v35 = vor.u32 %v1721_v31, %v1588_v30  ;;  %v1719_v37 = vld [vmem:[%s2701_s2 + $0x4c] sm:$0xf]  ;;  %v1590_v38 = vld [vmem:[%s2701_s2 + $0x58] sm:$0xf0]  ;;  %v1564_v39 = vld [vmem:[%s2701_s2 + $0x20] sm:$0xf] }
  0x1f   :  { %492 = vmatpush.bf16.msrb.mxu3 %v2176_v16  ;;  %1531 = vmatmul.msk.bf16.gmra.mxu0 %vm129_vm0, %v1699_v17  ;;  %v2244_v41 = vor.u32 %v1719_v37, %v1590_v38  ;;  %v1716_v42 = vld [vmem:[%s2701_s2 + $0x2c] sm:$0xf0]  ;;  %v1714_v43 = vld [vmem:[%s2701_s2 + $0x24] sm:$0xf]  ;;  %v1566_v45 = vld [vmem:[%s2701_s2 + $0x30] sm:$0xf0] }
  0x20   :  { %454 = vmatpush.bf16.msrb.mxu0 %v2174_v15  ;;  %1535 = vmatmul.msk.bf16.gmra.mxu1 %vm129_vm0, %v1699_v17  ;;  %v2256_v46 = vor.u32 %v1716_v42, %v1564_v39  ;;  %v2258_v47 = vor.u32 %v1714_v43, %v1566_v45  ;;  %v1572_v49 = vld [vmem:[%s2701_s2 + $0x28] sm:$0xf]  ;;  %v1717_v50 = vld [vmem:[%s2701_s2 + $0x34] sm:$0xf0]  ;;  %v1715_v51 = vld [vmem:[%s2701_s2 + $0x2c] sm:$0xf] }
  0x21   :  { %467 = vmatpush.bf16.msrb.mxu1 %v2182_v18  ;;  %1539 = vmatmul.msk.bf16.gmra.mxu2 %vm129_vm0, %v1699_v17  ;;  %v2270_v53 = vor.u32 %v1717_v50, %v1572_v49  ;;  %v1574_v55 = vld [vmem:[%s2701_s2 + $0x38] sm:$0xf0]  ;;  %v1548_v56 = vld [vmem:[%s2701_s2] sm:$0xf]  ;;  %v1712_v57 = vld [vmem:[%s2701_s2 + $0xc] sm:$0xf0] }
  0x22   :  { %1543 = vmatmul.msk.bf16.gmra.mxu3 %vm129_vm0, %v1699_v17  ;;  %480 = vmatpush.bf16.msrb.mxu2 %v2200_v22  ;;  %v2282_v60 = vor.u32 %v1715_v51, %v1574_v55  ;;  %v1710_v61 = vld [vmem:[%s2701_s2 + $0x4] sm:$0xf]  ;;  %v1550_v62 = vld [vmem:[%s2701_s2 + $0x10] sm:$0xf0]  ;;  %v1556_v63 = vld [vmem:[%s2701_s2 + $0x8] sm:$0xf]  ;;  %v2294_v0 = vor.u32 %v1712_v57, %v1548_v56 }
  0x23   :  { %493 = vmatpush.bf16.msrb.mxu3 %v2206_v24  ;;  %v1713_v1 = vld [vmem:[%s2701_s2 + $0x14] sm:$0xf0]  ;;  %v1711_v3 = vld [vmem:[%s2701_s2 + $0xc] sm:$0xf]  ;;  %v1558_v4 = vld [vmem:[%s2701_s2 + $0x18] sm:$0xf0]  ;;  %v2306_v7 = vor.u32 %v1710_v61, %v1550_v62 }
  0x24   :  { %455 = vmatpush.bf16.msrb.mxu0 %v2218_v28  ;;  %v2309_v8 = vor.u32 %v1713_v1, %v1556_v63  ;;  %v1902_v9 = vmov 0   ;;  %v1700_v11 = vld [vmem:[%s2699_s0 + $0x10] sm:$0xff]  ;;  %v2315_v12 = vor.u32 %v1711_v3, %v1558_v4  ;;  %v1701_v13 = vld [vmem:[%s2699_s0 + $0x18] sm:$0xff]  ;;  %v59_v20 = vld [vmem:[%s2702_s3] sm:$0xf] }
  0x25   :  { %468 = vmatpush.bf16.msrb.mxu1 %v2230_v34  ;;  %1744 = vset.pattern.permute.xlu0 %v1902_v9  ;;  %v61_v21 = vperm.slane %v59_v20, 0  ;;  %v62_v25 = vperm.slane %v59_v20, 1  ;;  %v2407_v37 = vperm.slane %v59_v20, 3  ;;  %v63_v38 = vperm.slane %v59_v20, 2 }
  0x26   :  { %481 = vmatpush.bf16.msrb.mxu2 %v2232_v35  ;;  %1745 = vset.pattern.permute.xlu1 %v1902_v9 }
  0x27   :  { %494 = vmatpush.bf16.msrb.mxu3 %v2244_v41 }
  0x28   :  { %456 = vmatpush.bf16.msrb.mxu0 %v2256_v46 }
  0x29   :  { %469 = vmatpush.bf16.msrb.mxu1 %v2258_v47 }
  0x2a   :  { %482 = vmatpush.bf16.msrb.mxu2 %v2270_v53 }
  0x2b   :  { %495 = vmatpush.bf16.msrb.mxu3 %v2282_v60 }
  0x2c   :  { %457 = vmatpush.bf16.msrb.mxu0 %v2294_v0 }
  0x2d   :  { %470 = vmatpush.bf16.msrb.mxu1 %v2306_v7 }
  0x2e   :  { %483 = vmatpush.bf16.msrb.mxu2 %v2309_v8 }
  0x2f   :  { %1532 = vmatmul.msk.bf16.gmra.mxu0 %vm129_vm0, %v1700_v11  ;;  %496 = vmatpush.bf16.msrb.mxu3 %v2315_v12 }
  0x30   :  { %570 = vmatpush.bf16.msra.mxu0 %v2031_v32  ;;  %1536 = vmatmul.msk.bf16.gmra.mxu1 %vm129_vm0, %v1700_v11 }
  0x31   :  { %583 = vmatpush.bf16.msra.mxu1 %v2033_v33  ;;  %1540 = vmatmul.msk.bf16.gmra.mxu2 %vm129_vm0, %v1700_v11 }
  0x32   :  { %1544 = vmatmul.msk.bf16.gmra.mxu3 %vm129_vm0, %v1700_v11  ;;  %596 = vmatpush.bf16.msra.mxu2 %v2041_v36 }
  0x33   :  { %609 = vmatpush.bf16.msra.mxu3 %v2079_v48 }
  0x34   :  { %571 = vmatpush.bf16.msra.mxu0 %v2053_v40 }
  0x35   :  { %584 = vmatpush.bf16.msra.mxu1 %v2066_v44 }
  0x36   :  { %597 = vmatpush.bf16.msra.mxu2 %v2092_v52 }
  0x37   :  { %610 = vmatpush.bf16.msra.mxu3 %v2113_v59 }
  0x38   :  { %572 = vmatpush.bf16.msra.mxu0 %v2099_v54 }
  0x39   :  { %585 = vmatpush.bf16.msra.mxu1 %v2111_v58 }
  0x3a   :  { %598 = vmatpush.bf16.msra.mxu2 %v2134_v2 }
  0x3b   :  { %611 = vmatpush.bf16.msra.mxu3 %v2146_v6 }
  0x3c   :  { %573 = vmatpush.bf16.msra.mxu0 %v2144_v5 }
  0x3d   :  { %586 = vmatpush.bf16.msra.mxu1 %v2158_v10 }
  0x3e   :  { %599 = vmatpush.bf16.msra.mxu2 %v2170_v14 }
  0x3f   :  { %612 = vmatpush.bf16.msra.mxu3 %v2176_v16  ;;  %1533 = vmatmul.msk.bf16.gmra.mxu0 %vm129_vm0, %v1701_v13 }
  0x40   :  { %574 = vmatpush.bf16.msra.mxu0 %v2174_v15  ;;  %1537 = vmatmul.msk.bf16.gmra.mxu1 %vm129_vm0, %v1701_v13 }
  0x41   :  { %587 = vmatpush.bf16.msra.mxu1 %v2182_v18  ;;  %1541 = vmatmul.msk.bf16.gmra.mxu2 %vm129_vm0, %v1701_v13 }
  0x42   :  { %1545 = vmatmul.msk.bf16.gmra.mxu3 %vm129_vm0, %v1701_v13  ;;  %600 = vmatpush.bf16.msra.mxu2 %v2200_v22 }
  0x43   :  { %613 = vmatpush.bf16.msra.mxu3 %v2206_v24 }
  0x44   :  { %575 = vmatpush.bf16.msra.mxu0 %v2218_v28 }
  0x45   :  { %588 = vmatpush.bf16.msra.mxu1 %v2230_v34 }
  0x46   :  { %601 = vmatpush.bf16.msra.mxu2 %v2232_v35 }
  0x47   :  { %614 = vmatpush.bf16.msra.mxu3 %v2244_v41 }
  0x48   :  { %576 = vmatpush.bf16.msra.mxu0 %v2256_v46 }
  0x49   :  { %589 = vmatpush.bf16.msra.mxu1 %v2258_v47 }
  0x4a   :  { %602 = vmatpush.bf16.msra.mxu2 %v2270_v53 }
  0x4b   :  { %615 = vmatpush.bf16.msra.mxu3 %v2282_v60 }
  0x4c   :  { %577 = vmatpush.bf16.msra.mxu0 %v2294_v0 }
  0x4d   :  { %590 = vmatpush.bf16.msra.mxu1 %v2306_v7 }
  0x4e   :  { %603 = vmatpush.bf16.msra.mxu2 %v2309_v8 }
  0x4f   :  { %616 = vmatpush.bf16.msra.mxu3 %v2315_v12  ;;  %458 = vmatmul.bf16.vlgmr.msrb.gmra.mxu0 %v1902_v9 }
  0x50   :  { %471 = vmatmul.bf16.vlgmr.msrb.gmra.mxu1 %v1902_v9  ;;  %690 = vmatpush.bf16.msrb.mxu0 %v2031_v32 }
  0x51   :  { %484 = vmatmul.bf16.vlgmr.msrb.gmra.mxu2 %v1902_v9  ;;  %703 = vmatpush.bf16.msrb.mxu1 %v2033_v33 }
  0x52   :  { %497 = vmatmul.bf16.vlgmr.msrb.gmra.mxu3 %v1902_v9  ;;  %716 = vmatpush.bf16.msrb.mxu2 %v2041_v36 }
  0x53   :  { %729 = vmatpush.bf16.msrb.mxu3 %v2079_v48 }
  0x54   :  { %691 = vmatpush.bf16.msrb.mxu0 %v2053_v40 }
  0x55   :  { %704 = vmatpush.bf16.msrb.mxu1 %v2066_v44 }
  0x56   :  { %717 = vmatpush.bf16.msrb.mxu2 %v2092_v52 }
  0x57   :  { %730 = vmatpush.bf16.msrb.mxu3 %v2113_v59 }
  0x58   :  { %692 = vmatpush.bf16.msrb.mxu0 %v2099_v54 }
  0x59   :  { %705 = vmatpush.bf16.msrb.mxu1 %v2111_v58 }
  0x5a   :  { %718 = vmatpush.bf16.msrb.mxu2 %v2134_v2 }
  0x5b   :  { %731 = vmatpush.bf16.msrb.mxu3 %v2146_v6 }
  0x5c   :  { %693 = vmatpush.bf16.msrb.mxu0 %v2144_v5 }
  0x5d   :  { %706 = vmatpush.bf16.msrb.mxu1 %v2158_v10 }
  0x5e   :  { %719 = vmatpush.bf16.msrb.mxu2 %v2170_v14 }
  0x5f   :  { %732 = vmatpush.bf16.msrb.mxu3 %v2176_v16 }
  0x60   :  { %694 = vmatpush.bf16.msrb.mxu0 %v2174_v15 }
  0x61   :  { %707 = vmatpush.bf16.msrb.mxu1 %v2182_v18 }
  0x62   :  { %720 = vmatpush.bf16.msrb.mxu2 %v2200_v22 }
  0x63   :  { %733 = vmatpush.bf16.msrb.mxu3 %v2206_v24 }
  0x64   :  { %695 = vmatpush.bf16.msrb.mxu0 %v2218_v28 }
  0x65   :  { %708 = vmatpush.bf16.msrb.mxu1 %v2230_v34 }
  0x66   :  { %721 = vmatpush.bf16.msrb.mxu2 %v2232_v35 }
  0x67   :  { %734 = vmatpush.bf16.msrb.mxu3 %v2244_v41 }
  0x68   :  { %696 = vmatpush.bf16.msrb.mxu0 %v2256_v46 }
  0x69   :  { %709 = vmatpush.bf16.msrb.mxu1 %v2258_v47 }
  0x6a   :  { %722 = vmatpush.bf16.msrb.mxu2 %v2270_v53 }
  0x6b   :  { %735 = vmatpush.bf16.msrb.mxu3 %v2282_v60 }
  0x6c   :  { %697 = vmatpush.bf16.msrb.mxu0 %v2294_v0 }
  0x6d   :  { %710 = vmatpush.bf16.msrb.mxu1 %v2306_v7 }
  0x6e   :  { %723 = vmatpush.bf16.msrb.mxu2 %v2309_v8 }
  0x6f   :  { %736 = vmatpush.bf16.msrb.mxu3 %v2315_v12 }
  0x8c   :  { %v151_v17 = vpop.f32.mrf.mxu0 }
  0x8d   :  { %v180_v19 = vpop.f32.mrf.mxu1 }
  0x94   :  { %v2399_v23 = vpop.f32.mrf.mxu2  ;;  %v153_v27 = vpop.f32.mrf.mxu0 }
  0x95   :  { %v2401_v26 = vpop.f32.mrf.mxu3  ;;  %v2403_v29 = vadd.f32 %v153_v27, %v61_v21  ;;  %v182_v30 = vpop.f32.mrf.mxu1 }
  0x96   :  { %v2405_v31 = vadd.f32 %v182_v30, %v62_v25 }
  0x9c   :  { %v211_v39 = vpop.f32.mrf.mxu2  ;;  %v156_v45 = vpop.f32.mrf.mxu0 }
  0x9d   :  { %v2409_v42 = vadd.f32 %v211_v39, %v63_v38  ;;  %v240_v43 = vpop.f32.mrf.mxu3  ;;  %v2414_v50 = vadd.f32 %v156_v45, %v61_v21  ;;  %v185_v51 = vpop.f32.mrf.mxu1 }
  0x9e   :  { %v2412_v49 = vadd.f32 %v240_v43, %v2407_v37  ;;  %v2416_v55 = vadd.f32 %v185_v51, %v62_v25 }
  0xa4   :  { %v214_v56 = vpop.f32.mrf.mxu2  ;;  %v158_v62 = vpop.f32.mrf.mxu0 }
  0xa5   :  { %v2418_v57 = vadd.f32 %v214_v56, %v63_v38  ;;  %v243_v61 = vpop.f32.mrf.mxu3  ;;  %v2423_v1 = vadd.f32 %v158_v62, %v61_v21  ;;  %v187_v3 = vpop.f32.mrf.mxu1 }
  0xa6   :  { %v2421_v63 = vadd.f32 %v243_v61, %v2407_v37  ;;  %v2425_v4 = vadd.f32 %v187_v3, %v62_v25 }
  0xa7   :  { %2710 = vst [vmem:[#allocation8_spill] sm:$0xff] %v2418_v57 }
  0xa8   :  { %2711 = vst [vmem:[#allocation9_spill] sm:$0xff] %v2421_v63 }
  0xa9   :  { %2712 = vst [vmem:[#allocation10_spill] sm:$0xff] %v2423_v1 }
  0xaa   :  { %2713 = vst [vmem:[#allocation11_spill] sm:$0xff] %v2425_v4 }
  0xac   :  { %v216_v9 = vpop.f32.mrf.mxu2  ;;  %v161_v20 = vpop.f32.mrf.mxu0 }
  0xad   :  { %v2427_v11 = vadd.f32 %v216_v9, %v63_v38  ;;  %v245_v13 = vpop.f32.mrf.mxu3  ;;  %v2432_v30 = vadd.f32 %v161_v20, %v61_v21  ;;  %v190_v39 = vpop.f32.mrf.mxu1 }
  0xae   :  { %v2430_v27 = vadd.f32 %v245_v13, %v2407_v37  ;;  %v2434_v43 = vadd.f32 %v190_v39, %v62_v25 }
  0xaf   :  { %2714 = vst [vmem:[#allocation12_spill] sm:$0xff] %v2427_v11 }
  0xb0   :  { %2715 = vst [vmem:[#allocation13_spill] sm:$0xff] %v2430_v27 }
  0xb1   :  { %2716 = vst [vmem:[#allocation14_spill] sm:$0xff] %v2432_v30 }
  0xb2   :  { %2717 = vst [vmem:[#allocation15_spill] sm:$0xff] %v2434_v43 }
  0xb4   :  { %v219_v45 = vpop.f32.mrf.mxu2  ;;  %v163_v61 = vpop.f32.mrf.mxu0 }
  0xb5   :  { %v2436_v51 = vadd.f32 %v219_v45, %v63_v38  ;;  %v248_v56 = vpop.f32.mrf.mxu3  ;;  %v2441_v3 = vadd.f32 %v163_v61, %v61_v21  ;;  %v192_v9 = vpop.f32.mrf.mxu1 }
  0xb6   :  { %v2439_v62 = vadd.f32 %v248_v56, %v2407_v37  ;;  %v2443_v11 = vadd.f32 %v192_v9, %v62_v25 }
  0xb7   :  { %2718 = vst [vmem:[#allocation16_spill] sm:$0xff] %v2436_v51 }
  0xb8   :  { %2719 = vst [vmem:[#allocation17_spill] sm:$0xff] %v2439_v62 }
  0xb9   :  { %2720 = vst [vmem:[#allocation18_spill] sm:$0xff] %v2441_v3 }
  0xba   :  { %2721 = vst [vmem:[#allocation19_spill] sm:$0xff] %v2443_v11 }
  0xbc   :  { %v221_v13 = vpop.f32.mrf.mxu2  ;;  %v166_v30 = vpop.f32.mrf.mxu0 }
  0xbd   :  { %v2445_v27 = vadd.f32 %v221_v13, %v63_v38  ;;  %v250_v20 = vpop.f32.mrf.mxu3  ;;  %v2450_v45 = vadd.f32 %v166_v30, %v61_v21  ;;  %v195_v51 = vpop.f32.mrf.mxu1  ;;  %v181_v30 = vadd.f32 %v180_v19, %v62_v25 }
  0xbe   :  { %v2448_v39 = vadd.f32 %v250_v20, %v2407_v37  ;;  %v2452_v43 = vadd.f32 %v195_v51, %v62_v25  ;;  %v152_v20 = vadd.f32 %v151_v17, %v61_v21 }
  0xbf   :  { %2722 = vst [vmem:[#allocation20_spill] sm:$0xff] %v2445_v27 }
  0xc0   :  { %2723 = vst [vmem:[#allocation21_spill] sm:$0xff] %v2448_v39 }
  0xc1   :  { %2724 = vst [vmem:[#allocation22_spill] sm:$0xff] %v2450_v45 }
  0xc2   :  { %2725 = vst [vmem:[#allocation23_spill] sm:$0xff] %v2452_v43 }
  0xc4   :  { %v224_v56 = vpop.f32.mrf.mxu2  ;;  %v168_v3 = vpop.f32.mrf.mxu0 }
  0xc5   :  { %v2454_v62 = vadd.f32 %v224_v56, %v63_v38  ;;  %v253_v61 = vpop.f32.mrf.mxu3  ;;  %v2459_v13 = vadd.f32 %v168_v3, %v61_v21  ;;  %v197_v27 = vpop.f32.mrf.mxu1  ;;  %v210_v3 = vadd.f32 %v2399_v23, %v63_v38  ;;  %v239_v23 = vadd.f32 %v2401_v26, %v2407_v37 }
  0xc6   :  { %v2457_v9 = vadd.f32 %v253_v61, %v2407_v37  ;;  %v2461_v11 = vadd.f32 %v197_v27, %v62_v25 }
  0xc7   :  { %2726 = vst [vmem:[#allocation24_spill] sm:$0xff] %v2454_v62 }
  0xc8   :  { %2727 = vst [vmem:[#allocation25_spill] sm:$0xff] %v2457_v9 }
  0xc9   :  { %2728 = vst [vmem:[#allocation26_spill] sm:$0xff] %v2459_v13 }
  0xca   :  { %2729 = vst [vmem:[#allocation27_spill] sm:$0xff] %v2461_v11 }
  0xcc   :  { %v226_v39 = vpop.f32.mrf.mxu2  ;;  %v459_v43 = vpop.f32.mrf.mxu0 }
  0xcd   :  { %v2463_v45 = vadd.f32 %v226_v39, %v63_v38  ;;  %v255_v51 = vpop.f32.mrf.mxu3  ;;  %v502_v62 = vadd.f32 %v459_v43, %v152_v20  ;;  %v472_v4 = vpop.f32.mrf.mxu1 }
  0xce   :  { %v2466_v56 = vadd.f32 %v255_v51, %v2407_v37  ;;  %v503_v1 = vadd.f32 %v472_v4, %v181_v30 }
  0xcf   :  { %2730 = vst [vmem:[#allocation28_spill] sm:$0xff] %v2463_v45  ;;  %v1674_v61 = vmul.f32 -1.442695, %v502_v62 }
  0xd0   :  { %2731 = vst [vmem:[#allocation29_spill] sm:$0xff] %v2466_v56  ;;  %v1675_v9 = vmul.f32 -1.442695, %v503_v1 }
  0xd1   :  { %1748 = vpow2.f32 %v1674_v61 }
  0xd2   :  { %1750 = vpow2.f32 %v1675_v9 }
  0xd4   :  { %v485_v27 = vpop.f32.mrf.mxu2  ;;  %v461_v19 = vpop.f32.mrf.mxu0 }
  0xd5   :  { %v504_v17 = vadd.f32 %v485_v27, %v210_v3  ;;  %v498_v21 = vpop.f32.mrf.mxu3  ;;  %v474_v25 = vpop.f32.mrf.mxu1 }
  0xd6   :  { %v505_v9 = vadd.f32 %v498_v21, %v239_v23 }
  0xd7   :  { %v1676_v39 = vmul.f32 -1.442695, %v504_v17  ;;  %v1749_v45 = vpop.eup %1748 }
  0xd8   :  { %v1751_v11 = vpop.eup %1750  ;;  %v515_v13 = vadd.f32 1.0, %v1749_v45 }
  0xd9   :  { %1752 = vpow2.f32 %v1676_v39  ;;  %v516_v51 = vadd.f32 1.0, %v1751_v11 }
  0xda   :  { %1754 = vrcp.f32 %v515_v13  ;;  %v529_v45 = vand.u32 2147483648, %v515_v13  ;;  %v527_v19 = vand.u32 2147483647, %v515_v13  ;;  %vm523_vm3 = vweird.f32 %v515_v13 }
  0xdb   :  { %1756 = vrcp.f32 %v516_v51  ;;  %v544_v11 = vand.u32 2147483648, %v516_v51  ;;  %v542_v39 = vand.u32 2147483647, %v516_v51  ;;  %vm538_vm4 = vweird.f32 %v516_v51 }
  0xdc   :  { %v487_v4 = vpop.f32.mrf.mxu2  ;;  %v530_v21 = vor.u32 1.1754944e-38, %v529_v45  ;;  %vm528_vm6 = vcmp.eq.f32.partialorder %v527_v19, 8.507059e+37 }
  0xdd   :  { %v500_v43 = vpop.f32.mrf.mxu3  ;;  %vm543_vm8 = vcmp.eq.f32.partialorder %v542_v39, 8.507059e+37 }
  0xdf   :  { %v1753_v1 = vpop.eup %1752 }
  0xe0   :  { %v517_v38 = vadd.f32 1.0, %v1753_v1  ;;  %v1755_v62 = vpop.eup %1754  ;;  %v545_v1 = vor.u32 1.1754944e-38, %v544_v11 }
  0xe1   :  { %v1757_v20 = vpop.eup %1756  ;;  %v519_v30 = vmul.f32 %v1755_v62, %v515_v13  ;;  %vm524_vm1 = vweird.f32 %v1755_v62 }
  0xe2   :  { %1758 = vrcp.f32 %v517_v38  ;;  %v534_v61 = vmul.f32 %v1757_v20, %v516_v51  ;;  %vm539_vm2 = vweird.f32 %v1757_v20  ;;  %vm525_vm5 = vmor %vm523_vm3, %vm524_vm1  ;;  %v559_v51 = vand.u32 2147483648, %v517_v38 }
  0xe3   :  { %v520_v3 = vsub.f32 1.0, %v519_v30  ;;  %1760 = vtanh.f32 %v505_v9  ;;  %vm540_vm7 = vmor %vm538_vm4, %vm539_vm2  ;;  %vm553_vm10 = vweird.f32 %v517_v38 }
  0xe4   :  { %v535_v27 = vsub.f32 1.0, %v534_v61  ;;  %v560_v11 = vor.u32 1.1754944e-38, %v559_v51 }
  0xe5   :  { %v521_v17 = vmul.f32 %v1755_v62, %v520_v3 }
  0xe6   :  { %v536_v25 = vmul.f32 %v1757_v20, %v535_v27 }
  0xe7   :  { %v522_v26 = vadd.f32 %v1755_v62, %v521_v17 }
  0xe8   :  { %v1759_v4 = vpop.eup %1758  ;;  %v537_v43 = vadd.f32 %v1757_v20, %v536_v25 }
  0xe9   :  { %v549_v37 = vmul.f32 %v1759_v4, %v517_v38  ;;  %v526_v23 = vsel %vm525_vm5, %v1755_v62, %v522_v26  ;;  %v1761_v9 = vpop.eup %1760  ;;  %vm554_vm9 = vweird.f32 %v1759_v4  ;;  %v557_v62 = vand.u32 2147483647, %v517_v38 }
  0xea   :  { %v531_v61 = vsel %vm528_vm6, %v530_v21, %v526_v23  ;;  %v541_v3 = vsel %vm540_vm7, %v1757_v20, %v537_v43  ;;  %vm555_vm11 = vmor %vm553_vm10, %vm554_vm9 }
  0xeb   :  { %v550_v30 = vsub.f32 1.0, %v549_v37  ;;  %v546_v27 = vsel %vm543_vm8, %v545_v1, %v541_v3  ;;  %v565_v56 = vmul.f32 %v1761_v9, %v531_v61  ;;  %vm558_vm12 = vcmp.eq.f32.partialorder %v557_v62, 8.507059e+37 }
  0xec   :  { %v564_v63 = vmul.f32 0.0, %v546_v27 }
  0xed   :  { %v551_v57 = vmul.f32 %v1759_v4, %v550_v30 }
  0xee   :  { %v2471_v17 = vadd.f32 %v565_v56, %v564_v63 }
  0xef   :  { %v552_v13 = vadd.f32 %v1759_v4, %v551_v57 }
  0xf0   :  { %1762 = vtanh.f32 %v2471_v17 }
  0xf1   :  { %v556_v45 = vsel %vm555_vm11, %v1759_v4, %v552_v13 }
  0xf2   :  { %v561_v20 = vsel %vm558_vm12, %v560_v11, %v556_v45 }
  0xf6   :  { %v1763_v19 = vpop.eup %1762 }
  0xf7   :  { %v568_v25 = vmul.f32 %v1763_v19, %v561_v20 }
  0xf9   :  { %v569_v39 = vpack.c.bf16 %v568_v25, %v568_v25 }
  0xfb   :  { %578 = vmatmul.bf16.vlgmr.msra.gmra.mxu0 %v569_v39  ;;  %591 = vmatmul.bf16.vlgmr.msra.gmra.mxu1 %v569_v39 }
  0xfc   :  { %604 = vmatmul.bf16.vlgmr.msra.gmra.mxu2 %v569_v39  ;;  %617 = vmatmul.bf16.vlgmr.msra.gmra.mxu3 %v569_v39 }
  0xfd   :  { %810 = vmatpush.bf16.msra.mxu0 %v2031_v32  ;;  %823 = vmatpush.bf16.msra.mxu1 %v2033_v33 }
  0xfe   :  { %836 = vmatpush.bf16.msra.mxu2 %v2041_v36  ;;  %849 = vmatpush.bf16.msra.mxu3 %v2079_v48 }
 0x101   :  { %811 = vmatpush.bf16.msra.mxu0 %v2053_v40  ;;  %824 = vmatpush.bf16.msra.mxu1 %v2066_v44 }
 0x102   :  { %837 = vmatpush.bf16.msra.mxu2 %v2092_v52  ;;  %850 = vmatpush.bf16.msra.mxu3 %v2113_v59 }
 0x105   :  { %812 = vmatpush.bf16.msra.mxu0 %v2099_v54  ;;  %825 = vmatpush.bf16.msra.mxu1 %v2111_v58 }
 0x106   :  { %838 = vmatpush.bf16.msra.mxu2 %v2134_v2  ;;  %851 = vmatpush.bf16.msra.mxu3 %v2146_v6 }
 0x109   :  { %813 = vmatpush.bf16.msra.mxu0 %v2144_v5  ;;  %826 = vmatpush.bf16.msra.mxu1 %v2158_v10 }
 0x10a   :  { %839 = vmatpush.bf16.msra.mxu2 %v2170_v14  ;;  %852 = vmatpush.bf16.msra.mxu3 %v2176_v16 }
 0x10d   :  { %814 = vmatpush.bf16.msra.mxu0 %v2174_v15  ;;  %827 = vmatpush.bf16.msra.mxu1 %v2182_v18 }
 0x10e   :  { %840 = vmatpush.bf16.msra.mxu2 %v2200_v22  ;;  %853 = vmatpush.bf16.msra.mxu3 %v2206_v24 }
 0x111   :  { %815 = vmatpush.bf16.msra.mxu0 %v2218_v28  ;;  %828 = vmatpush.bf16.msra.mxu1 %v2230_v34 }
 0x112   :  { %841 = vmatpush.bf16.msra.mxu2 %v2232_v35  ;;  %854 = vmatpush.bf16.msra.mxu3 %v2244_v41 }
 0x115   :  { %816 = vmatpush.bf16.msra.mxu0 %v2256_v46  ;;  %829 = vmatpush.bf16.msra.mxu1 %v2258_v47 }
 0x116   :  { %842 = vmatpush.bf16.msra.mxu2 %v2270_v53  ;;  %855 = vmatpush.bf16.msra.mxu3 %v2282_v60 }
 0x119   :  { %817 = vmatpush.bf16.msra.mxu0 %v2294_v0  ;;  %830 = vmatpush.bf16.msra.mxu1 %v2306_v7 }
 0x11a   :  { %843 = vmatpush.bf16.msra.mxu2 %v2309_v8  ;;  %856 = vmatpush.bf16.msra.mxu3 %v2315_v12 }
 0x178   :  { %v579_v57 = vpop.f32.mrf.mxu0  ;;  %v592_v63 = vpop.f32.mrf.mxu1 }
 0x179   :  { %v622_v56 = vadd.f32 %v579_v57, %v2403_v29  ;;  %v623_v38 = vadd.f32 %v592_v63, %v2405_v31 }
 0x17b   :  { %v1677_v4 = vmul.f32 -1.442695, %v622_v56  ;;  %v1678_v26 = vmul.f32 -1.442695, %v623_v38 }
 0x17d   :  { %1764 = vpow2.f32 %v1677_v4 }
 0x17e   :  { %1766 = vpow2.f32 %v1678_v26 }
 0x17f   :  { %v605_v37 = vpop.f32.mrf.mxu2  ;;  %v618_v21 = vpop.f32.mrf.mxu3 }
 0x180   :  { %v624_v43 = vadd.f32 %v605_v37, %v2409_v42  ;;  %v581_v1 = vpop.f32.mrf.mxu0  ;;  %v594_v23 = vpop.f32.mrf.mxu1  ;;  %v625_v45 = vadd.f32 %v618_v21, %v2412_v49 }
 0x182   :  { %v1679_v9 = vmul.f32 -1.442695, %v624_v43 }
 0x183   :  { %v1765_v30 = vpop.eup %1764 }
 0x184   :  { %v1767_v61 = vpop.eup %1766  ;;  %v635_v3 = vadd.f32 1.0, %v1765_v30  ;;  %1768 = vpow2.f32 %v1679_v9 }
 0x185   :  { %v636_v27 = vadd.f32 1.0, %v1767_v61 }
 0x186   :  { %1770 = vrcp.f32 %v635_v3  ;;  %v649_v39 = vand.u32 2147483648, %v635_v3  ;;  %v647_v56 = vand.u32 2147483647, %v635_v3  ;;  %vm643_vm15 = vweird.f32 %v635_v3 }
 0x187   :  { %1772 = vrcp.f32 %v636_v27  ;;  %v607_v29 = vpop.f32.mrf.mxu2  ;;  %v620_v31 = vpop.f32.mrf.mxu3  ;;  %v664_v57 = vand.u32 2147483648, %v636_v27  ;;  %v662_v4 = vand.u32 2147483647, %v636_v27  ;;  %vm658_vm0 = vweird.f32 %v636_v27 }
 0x188   :  { %v650_v21 = vor.u32 1.1754944e-38, %v649_v39  ;;  %vm648_vm3 = vcmp.eq.f32.partialorder %v647_v56, 8.507059e+37 }
 0x189   :  { %v665_v1 = vor.u32 1.1754944e-38, %v664_v57  ;;  %vm663_vm4 = vcmp.eq.f32.partialorder %v662_v4, 8.507059e+37 }
 0x18a   :  { %v1769_v13 = vpop.eup %1768 }
 0x18b   :  { %v637_v51 = vadd.f32 1.0, %v1769_v13 }
 0x18c   :  { %v1771_v62 = vpop.eup %1770 }
 0x18d   :  { %v1773_v11 = vpop.eup %1772  ;;  %v639_v19 = vmul.f32 %v1771_v62, %v635_v3  ;;  %1774 = vrcp.f32 %v637_v51  ;;  %vm644_vm13 = vweird.f32 %v1771_v62  ;;  %vm673_vm6 = vweird.f32 %v637_v51 }
 0x18e   :  { %v654_v42 = vmul.f32 %v1773_v11, %v636_v27  ;;  %1776 = vtanh.f32 %v625_v45  ;;  %vm659_vm14 = vweird.f32 %v1773_v11  ;;  %vm645_vm1 = vmor %vm643_vm15, %vm644_vm13 }
 0x18f   :  { %v640_v20 = vsub.f32 1.0, %v639_v19  ;;  %vm660_vm2 = vmor %vm658_vm0, %vm659_vm14 }
 0x190   :  { %v655_v25 = vsub.f32 1.0, %v654_v42  ;;  %v679_v42 = vand.u32 2147483648, %v637_v51 }
 0x191   :  { %v641_v63 = vmul.f32 %v1771_v62, %v640_v20 }
 0x192   :  { %v656_v38 = vmul.f32 %v1773_v11, %v655_v25  ;;  %v680_v25 = vor.u32 1.1754944e-38, %v679_v42 }
 0x193   :  { %v1775_v26 = vpop.eup %1774  ;;  %v642_v37 = vadd.f32 %v1771_v62, %v641_v63 }
 0x194   :  { %v669_v49 = vmul.f32 %v1775_v26, %v637_v51  ;;  %v657_v43 = vadd.f32 %v1773_v11, %v656_v38  ;;  %v1777_v9 = vpop.eup %1776  ;;  %vm674_vm5 = vweird.f32 %v1775_v26 }
 0x195   :  { %v646_v23 = vsel %vm645_vm1, %v1771_v62, %v642_v37  ;;  %v677_v62 = vand.u32 2147483647, %v637_v51  ;;  %vm675_vm7 = vmor %vm673_vm6, %vm674_vm5 }
 0x196   :  { %v670_v30 = vsub.f32 1.0, %v669_v49  ;;  %v651_v61 = vsel %vm648_vm3, %v650_v21, %v646_v23  ;;  %v661_v29 = vsel %vm660_vm2, %v1773_v11, %v657_v43  ;;  %v2732_v21 = vld [vmem:[#allocation8_spill] sm:$0xff] }
 0x197   :  { %v666_v31 = vsel %vm663_vm4, %v665_v1, %v661_v29  ;;  %v685_v13 = vmul.f32 %v1777_v9, %v651_v61  ;;  %vm678_vm8 = vcmp.eq.f32.partialorder %v677_v62, 8.507059e+37 }
 0x198   :  { %v684_v45 = vmul.f32 %v666_v31, %v2471_v17  ;;  %v671_v19 = vmul.f32 %v1775_v26, %v670_v30 }
 0x19a   :  { %v2511_v3 = vadd.f32 %v685_v13, %v684_v45  ;;  %v672_v27 = vadd.f32 %v1775_v26, %v671_v19 }
 0x19c   :  { %1778 = vtanh.f32 %v2511_v3  ;;  %v676_v20 = vsel %vm675_vm7, %v1775_v26, %v672_v27  ;;  %v2733_v27 = vld [vmem:[#allocation9_spill] sm:$0xff] }
 0x19d   :  { %v681_v39 = vsel %vm678_vm8, %v680_v25, %v676_v20 }
 0x1a2   :  { %v1779_v11 = vpop.eup %1778 }
 0x1a3   :  { %v688_v57 = vmul.f32 %v1779_v11, %v681_v39 }
 0x1a5   :  { %v689_v63 = vpack.c.bf16 %v688_v57, %v688_v57 }
 0x1a7   :  { %698 = vmatmul.bf16.vlgmr.msrb.gmra.mxu0 %v689_v63  ;;  %711 = vmatmul.bf16.vlgmr.msrb.gmra.mxu1 %v689_v63 }
 0x1a8   :  { %724 = vmatmul.bf16.vlgmr.msrb.gmra.mxu2 %v689_v63  ;;  %737 = vmatmul.bf16.vlgmr.msrb.gmra.mxu3 %v689_v63 }
 0x1a9   :  { %930 = vmatpush.bf16.msrb.mxu0 %v2031_v32  ;;  %943 = vmatpush.bf16.msrb.mxu1 %v2033_v33 }
 0x1aa   :  { %956 = vmatpush.bf16.msrb.mxu2 %v2041_v36  ;;  %969 = vmatpush.bf16.msrb.mxu3 %v2079_v48 }
 0x1ad   :  { %931 = vmatpush.bf16.msrb.mxu0 %v2053_v40  ;;  %944 = vmatpush.bf16.msrb.mxu1 %v2066_v44 }
 0x1ae   :  { %957 = vmatpush.bf16.msrb.mxu2 %v2092_v52  ;;  %970 = vmatpush.bf16.msrb.mxu3 %v2113_v59 }
 0x1b1   :  { %932 = vmatpush.bf16.msrb.mxu0 %v2099_v54  ;;  %945 = vmatpush.bf16.msrb.mxu1 %v2111_v58 }
 0x1b2   :  { %958 = vmatpush.bf16.msrb.mxu2 %v2134_v2  ;;  %971 = vmatpush.bf16.msrb.mxu3 %v2146_v6 }
 0x1b5   :  { %933 = vmatpush.bf16.msrb.mxu0 %v2144_v5  ;;  %946 = vmatpush.bf16.msrb.mxu1 %v2158_v10 }
 0x1b6   :  { %959 = vmatpush.bf16.msrb.mxu2 %v2170_v14  ;;  %972 = vmatpush.bf16.msrb.mxu3 %v2176_v16 }
 0x1b9   :  { %934 = vmatpush.bf16.msrb.mxu0 %v2174_v15  ;;  %947 = vmatpush.bf16.msrb.mxu1 %v2182_v18 }
 0x1ba   :  { %960 = vmatpush.bf16.msrb.mxu2 %v2200_v22  ;;  %973 = vmatpush.bf16.msrb.mxu3 %v2206_v24 }
 0x1bd   :  { %935 = vmatpush.bf16.msrb.mxu0 %v2218_v28  ;;  %948 = vmatpush.bf16.msrb.mxu1 %v2230_v34 }
 0x1be   :  { %961 = vmatpush.bf16.msrb.mxu2 %v2232_v35  ;;  %974 = vmatpush.bf16.msrb.mxu3 %v2244_v41 }
 0x1c1   :  { %936 = vmatpush.bf16.msrb.mxu0 %v2256_v46  ;;  %949 = vmatpush.bf16.msrb.mxu1 %v2258_v47 }
 0x1c2   :  { %962 = vmatpush.bf16.msrb.mxu2 %v2270_v53  ;;  %975 = vmatpush.bf16.msrb.mxu3 %v2282_v60 }
 0x1c5   :  { %937 = vmatpush.bf16.msrb.mxu0 %v2294_v0  ;;  %950 = vmatpush.bf16.msrb.mxu1 %v2306_v7 }
 0x1c6   :  { %963 = vmatpush.bf16.msrb.mxu2 %v2309_v8  ;;  %976 = vmatpush.bf16.msrb.mxu3 %v2315_v12 }
 0x224   :  { %v699_v17 = vpop.f32.mrf.mxu0  ;;  %v712_v51 = vpop.f32.mrf.mxu1 }
 0x225   :  { %v742_v56 = vadd.f32 %v699_v17, %v2414_v50  ;;  %v743_v38 = vadd.f32 %v712_v51, %v2416_v55 }
 0x227   :  { %v1680_v4 = vmul.f32 -1.442695, %v742_v56  ;;  %v1681_v26 = vmul.f32 -1.442695, %v743_v38 }
 0x229   :  { %1780 = vpow2.f32 %v1680_v4 }
 0x22a   :  { %1782 = vpow2.f32 %v1681_v26 }
 0x22b   :  { %v725_v37 = vpop.f32.mrf.mxu2  ;;  %v738_v49 = vpop.f32.mrf.mxu3 }
 0x22c   :  { %v744_v43 = vadd.f32 %v725_v37, %v2732_v21  ;;  %v701_v1 = vpop.f32.mrf.mxu0  ;;  %v714_v23 = vpop.f32.mrf.mxu1  ;;  %v745_v42 = vadd.f32 %v738_v49, %v2733_v27 }
 0x22e   :  { %v1682_v9 = vmul.f32 -1.442695, %v744_v43 }
 0x22f   :  { %v1781_v30 = vpop.eup %1780 }
 0x230   :  { %v1783_v61 = vpop.eup %1782  ;;  %v755_v29 = vadd.f32 1.0, %v1781_v30  ;;  %1784 = vpow2.f32 %v1682_v9 }
 0x231   :  { %v756_v31 = vadd.f32 1.0, %v1783_v61 }
 0x232   :  { %1786 = vrcp.f32 %v755_v29  ;;  %v769_v57 = vand.u32 2147483648, %v755_v29  ;;  %v767_v51 = vand.u32 2147483647, %v755_v29  ;;  %vm763_vm11 = vweird.f32 %v755_v29 }
 0x233   :  { %1788 = vrcp.f32 %v756_v31  ;;  %v727_v50 = vpop.f32.mrf.mxu2  ;;  %v740_v55 = vpop.f32.mrf.mxu3  ;;  %v784_v63 = vand.u32 2147483648, %v756_v31  ;;  %v782_v38 = vand.u32 2147483647, %v756_v31  ;;  %vm778_vm12 = vweird.f32 %v756_v31 }
 0x234   :  { %v770_v49 = vor.u32 1.1754944e-38, %v769_v57  ;;  %vm768_vm15 = vcmp.eq.f32.partialorder %v767_v51, 8.507059e+37  ;;  %v2735_v51 = vld [vmem:[#allocation11_spill] sm:$0xff] }
 0x235   :  { %v785_v43 = vor.u32 1.1754944e-38, %v784_v63  ;;  %vm783_vm0 = vcmp.eq.f32.partialorder %v782_v38, 8.507059e+37  ;;  %v2734_v63 = vld [vmem:[#allocation10_spill] sm:$0xff] }
 0x236   :  { %v1785_v13 = vpop.eup %1784 }
 0x237   :  { %v757_v45 = vadd.f32 1.0, %v1785_v13 }
 0x238   :  { %v1787_v19 = vpop.eup %1786 }
 0x239   :  { %v1789_v62 = vpop.eup %1788  ;;  %v759_v20 = vmul.f32 %v1787_v19, %v755_v29  ;;  %1790 = vrcp.f32 %v757_v45  ;;  %vm764_vm9 = vweird.f32 %v1787_v19  ;;  %vm793_vm2 = vweird.f32 %v757_v45 }
 0x23a   :  { %v774_v25 = vmul.f32 %v1789_v62, %v756_v31  ;;  %1792 = vtanh.f32 %v745_v42  ;;  %vm779_vm10 = vweird.f32 %v1789_v62  ;;  %vm765_vm13 = vmor %vm763_vm11, %vm764_vm9  ;;  %v799_v42 = vand.u32 2147483648, %v757_v45 }
 0x23b   :  { %v760_v11 = vsub.f32 1.0, %v759_v20  ;;  %vm780_vm14 = vmor %vm778_vm12, %vm779_vm10 }
 0x23c   :  { %v775_v39 = vsub.f32 1.0, %v774_v25  ;;  %v800_v25 = vor.u32 1.1754944e-38, %v799_v42 }
 0x23d   :  { %v761_v17 = vmul.f32 %v1787_v19, %v760_v11 }
 0x23e   :  { %v776_v56 = vmul.f32 %v1789_v62, %v775_v39 }
 0x23f   :  { %v1791_v4 = vpop.eup %1790  ;;  %v762_v26 = vadd.f32 %v1787_v19, %v761_v17 }
 0x240   :  { %v789_v37 = vmul.f32 %v1791_v4, %v757_v45  ;;  %v777_v21 = vadd.f32 %v1789_v62, %v776_v56  ;;  %v1793_v23 = vpop.eup %1792  ;;  %vm794_vm1 = vweird.f32 %v1791_v4 }
 0x241   :  { %v766_v1 = vsel %vm765_vm13, %v1787_v19, %v762_v26  ;;  %v797_v19 = vand.u32 2147483647, %v757_v45  ;;  %vm795_vm3 = vmor %vm793_vm2, %vm794_vm1 }
 0x242   :  { %v790_v9 = vsub.f32 1.0, %v789_v37  ;;  %v771_v30 = vsel %vm768_vm15, %v770_v49, %v766_v1  ;;  %v781_v61 = vsel %vm780_vm14, %v1789_v62, %v777_v21  ;;  %v2736_v49 = vld [vmem:[#allocation12_spill] sm:$0xff] }
 0x243   :  { %v786_v50 = vsel %vm783_vm0, %v785_v43, %v781_v61  ;;  %v805_v55 = vmul.f32 %v1793_v23, %v771_v30  ;;  %vm798_vm4 = vcmp.eq.f32.partialorder %v797_v19, 8.507059e+37  ;;  %v2737_v19 = vld [vmem:[#allocation13_spill] sm:$0xff] }
 0x244   :  { %v804_v13 = vmul.f32 %v786_v50, %v2511_v3  ;;  %v791_v27 = vmul.f32 %v1791_v4, %v790_v9 }
 0x246   :  { %v2551_v29 = vadd.f32 %v805_v55, %v804_v13  ;;  %v792_v31 = vadd.f32 %v1791_v4, %v791_v27 }
 0x248   :  { %1794 = vtanh.f32 %v2551_v29  ;;  %v796_v20 = vsel %vm795_vm3, %v1791_v4, %v792_v31 }
 0x249   :  { %v801_v11 = vsel %vm798_vm4, %v800_v25, %v796_v20 }
 0x24e   :  { %v1795_v62 = vpop.eup %1794 }
 0x24f   :  { %v808_v39 = vmul.f32 %v1795_v62, %v801_v11 }
 0x251   :  { %v809_v57 = vpack.c.bf16 %v808_v39, %v808_v39 }
 0x253   :  { %818 = vmatmul.bf16.vlgmr.msra.gmra.mxu0 %v809_v57  ;;  %831 = vmatmul.bf16.vlgmr.msra.gmra.mxu1 %v809_v57 }
 0x254   :  { %844 = vmatmul.bf16.vlgmr.msra.gmra.mxu2 %v809_v57  ;;  %857 = vmatmul.bf16.vlgmr.msra.gmra.mxu3 %v809_v57 }
 0x255   :  { %1050 = vmatpush.bf16.msra.mxu0 %v2031_v32  ;;  %1063 = vmatpush.bf16.msra.mxu1 %v2033_v33 }
 0x256   :  { %1076 = vmatpush.bf16.msra.mxu2 %v2041_v36  ;;  %1089 = vmatpush.bf16.msra.mxu3 %v2079_v48 }
 0x259   :  { %1051 = vmatpush.bf16.msra.mxu0 %v2053_v40  ;;  %1064 = vmatpush.bf16.msra.mxu1 %v2066_v44 }
 0x25a   :  { %1077 = vmatpush.bf16.msra.mxu2 %v2092_v52  ;;  %1090 = vmatpush.bf16.msra.mxu3 %v2113_v59 }
 0x25d   :  { %1052 = vmatpush.bf16.msra.mxu0 %v2099_v54  ;;  %1065 = vmatpush.bf16.msra.mxu1 %v2111_v58 }
 0x25e   :  { %1078 = vmatpush.bf16.msra.mxu2 %v2134_v2  ;;  %1091 = vmatpush.bf16.msra.mxu3 %v2146_v6 }
 0x261   :  { %1053 = vmatpush.bf16.msra.mxu0 %v2144_v5  ;;  %1066 = vmatpush.bf16.msra.mxu1 %v2158_v10 }
 0x262   :  { %1079 = vmatpush.bf16.msra.mxu2 %v2170_v14  ;;  %1092 = vmatpush.bf16.msra.mxu3 %v2176_v16 }
 0x265   :  { %1054 = vmatpush.bf16.msra.mxu0 %v2174_v15  ;;  %1067 = vmatpush.bf16.msra.mxu1 %v2182_v18 }
 0x266   :  { %1080 = vmatpush.bf16.msra.mxu2 %v2200_v22  ;;  %1093 = vmatpush.bf16.msra.mxu3 %v2206_v24 }
 0x269   :  { %1055 = vmatpush.bf16.msra.mxu0 %v2218_v28  ;;  %1068 = vmatpush.bf16.msra.mxu1 %v2230_v34 }
 0x26a   :  { %1081 = vmatpush.bf16.msra.mxu2 %v2232_v35  ;;  %1094 = vmatpush.bf16.msra.mxu3 %v2244_v41 }
 0x26d   :  { %1056 = vmatpush.bf16.msra.mxu0 %v2256_v46  ;;  %1069 = vmatpush.bf16.msra.mxu1 %v2258_v47 }
 0x26e   :  { %1082 = vmatpush.bf16.msra.mxu2 %v2270_v53  ;;  %1095 = vmatpush.bf16.msra.mxu3 %v2282_v60 }
 0x271   :  { %1057 = vmatpush.bf16.msra.mxu0 %v2294_v0  ;;  %1070 = vmatpush.bf16.msra.mxu1 %v2306_v7 }
 0x272   :  { %1083 = vmatpush.bf16.msra.mxu2 %v2309_v8  ;;  %1096 = vmatpush.bf16.msra.mxu3 %v2315_v12 }
 0x2d0   :  { %v819_v3 = vpop.f32.mrf.mxu0  ;;  %v832_v45 = vpop.f32.mrf.mxu1 }
 0x2d1   :  { %v862_v17 = vadd.f32 %v819_v3, %v2734_v63  ;;  %v863_v56 = vadd.f32 %v832_v45, %v2735_v51 }
 0x2d3   :  { %v1683_v38 = vmul.f32 -1.442695, %v862_v17  ;;  %v1684_v4 = vmul.f32 -1.442695, %v863_v56 }
 0x2d5   :  { %1796 = vpow2.f32 %v1683_v38 }
 0x2d6   :  { %1798 = vpow2.f32 %v1684_v4 }
 0x2d7   :  { %v845_v26 = vpop.f32.mrf.mxu2  ;;  %v858_v37 = vpop.f32.mrf.mxu3 }
 0x2d8   :  { %v864_v21 = vadd.f32 %v845_v26, %v2736_v49  ;;  %v821_v43 = vpop.f32.mrf.mxu0  ;;  %v834_v1 = vpop.f32.mrf.mxu1  ;;  %v865_v20 = vadd.f32 %v858_v37, %v2737_v19 }
 0x2da   :  { %v1685_v23 = vmul.f32 -1.442695, %v864_v21 }
 0x2db   :  { %v1797_v9 = vpop.eup %1796 }
 0x2dc   :  { %v1799_v30 = vpop.eup %1798  ;;  %v875_v61 = vadd.f32 1.0, %v1797_v9  ;;  %1800 = vpow2.f32 %v1685_v23 }
 0x2dd   :  { %v876_v50 = vadd.f32 1.0, %v1799_v30 }
 0x2de   :  { %1802 = vrcp.f32 %v875_v61  ;;  %v889_v3 = vand.u32 2147483648, %v875_v61  ;;  %v887_v17 = vand.u32 2147483647, %v875_v61  ;;  %vm883_vm7 = vweird.f32 %v875_v61 }
 0x2df   :  { %1804 = vrcp.f32 %v876_v50  ;;  %v847_v55 = vpop.f32.mrf.mxu2  ;;  %v860_v13 = vpop.f32.mrf.mxu3  ;;  %v904_v45 = vand.u32 2147483648, %v876_v50  ;;  %v902_v56 = vand.u32 2147483647, %v876_v50  ;;  %vm898_vm8 = vweird.f32 %v876_v50 }
 0x2e0   :  { %v890_v37 = vor.u32 1.1754944e-38, %v889_v3  ;;  %vm888_vm11 = vcmp.eq.f32.partialorder %v887_v17, 8.507059e+37  ;;  %v2739_v17 = vld [vmem:[#allocation15_spill] sm:$0xff] }
 0x2e1   :  { %v905_v21 = vor.u32 1.1754944e-38, %v904_v45  ;;  %vm903_vm12 = vcmp.eq.f32.partialorder %v902_v56, 8.507059e+37  ;;  %v2738_v45 = vld [vmem:[#allocation14_spill] sm:$0xff] }
 0x2e2   :  { %v1801_v27 = vpop.eup %1800 }
 0x2e3   :  { %v877_v31 = vadd.f32 1.0, %v1801_v27 }
 0x2e4   :  { %v1803_v42 = vpop.eup %1802 }
 0x2e5   :  { %v1805_v25 = vpop.eup %1804  ;;  %v879_v62 = vmul.f32 %v1803_v42, %v875_v61  ;;  %1806 = vrcp.f32 %v877_v31  ;;  %vm884_vm5 = vweird.f32 %v1803_v42  ;;  %vm913_vm14 = vweird.f32 %v877_v31 }
 0x2e6   :  { %v894_v11 = vmul.f32 %v1805_v25, %v876_v50  ;;  %1808 = vtanh.f32 %v865_v20  ;;  %vm899_vm6 = vweird.f32 %v1805_v25  ;;  %vm885_vm9 = vmor %vm883_vm7, %vm884_vm5  ;;  %v919_v20 = vand.u32 2147483648, %v877_v31 }
 0x2e7   :  { %v880_v39 = vsub.f32 1.0, %v879_v62  ;;  %vm900_vm10 = vmor %vm898_vm8, %vm899_vm6 }
 0x2e8   :  { %v895_v57 = vsub.f32 1.0, %v894_v11  ;;  %v920_v11 = vor.u32 1.1754944e-38, %v919_v20 }
 0x2e9   :  { %v881_v63 = vmul.f32 %v1803_v42, %v880_v39 }
 0x2ea   :  { %v896_v51 = vmul.f32 %v1805_v25, %v895_v57 }
 0x2eb   :  { %v1807_v38 = vpop.eup %1806  ;;  %v882_v4 = vadd.f32 %v1803_v42, %v881_v63 }
 0x2ec   :  { %v909_v26 = vmul.f32 %v1807_v38, %v877_v31  ;;  %v897_v49 = vadd.f32 %v1805_v25, %v896_v51  ;;  %v1809_v1 = vpop.eup %1808  ;;  %vm914_vm13 = vweird.f32 %v1807_v38 }
 0x2ed   :  { %v886_v43 = vsel %vm885_vm9, %v1803_v42, %v882_v4  ;;  %v917_v42 = vand.u32 2147483647, %v877_v31  ;;  %vm915_vm15 = vmor %vm913_vm14, %vm914_vm13 }
 0x2ee   :  { %v910_v23 = vsub.f32 1.0, %v909_v26  ;;  %v891_v9 = vsel %vm888_vm11, %v890_v37, %v886_v43  ;;  %v901_v30 = vsel %vm900_vm10, %v1805_v25, %v897_v49  ;;  %v2740_v37 = vld [vmem:[#allocation16_spill] sm:$0xff] }
 0x2ef   :  { %v906_v55 = vsel %vm903_vm12, %v905_v21, %v901_v30  ;;  %v925_v13 = vmul.f32 %v1809_v1, %v891_v9  ;;  %vm918_vm0 = vcmp.eq.f32.partialorder %v917_v42, 8.507059e+37  ;;  %v2741_v42 = vld [vmem:[#allocation17_spill] sm:$0xff] }
 0x2f0   :  { %v924_v27 = vmul.f32 %v906_v55, %v2551_v29  ;;  %v911_v19 = vmul.f32 %v1807_v38, %v910_v23 }
 0x2f2   :  { %v2591_v61 = vadd.f32 %v925_v13, %v924_v27  ;;  %v912_v50 = vadd.f32 %v1807_v38, %v911_v19 }
 0x2f4   :  { %1810 = vtanh.f32 %v2591_v61  ;;  %v916_v62 = vsel %vm915_vm15, %v1807_v38, %v912_v50 }
 0x2f5   :  { %v921_v39 = vsel %vm918_vm0, %v920_v11, %v916_v62 }
 0x2fa   :  { %v1811_v25 = vpop.eup %1810 }
 0x2fb   :  { %v928_v57 = vmul.f32 %v1811_v25, %v921_v39 }
 0x2fd   :  { %v929_v3 = vpack.c.bf16 %v928_v57, %v928_v57 }
 0x2ff   :  { %938 = vmatmul.bf16.vlgmr.msrb.gmra.mxu0 %v929_v3  ;;  %951 = vmatmul.bf16.vlgmr.msrb.gmra.mxu1 %v929_v3 }
 0x300   :  { %964 = vmatmul.bf16.vlgmr.msrb.gmra.mxu2 %v929_v3  ;;  %977 = vmatmul.bf16.vlgmr.msrb.gmra.mxu3 %v929_v3 }
 0x301   :  { %1170 = vmatpush.bf16.msrb.mxu0 %v2031_v32  ;;  %1183 = vmatpush.bf16.msrb.mxu1 %v2033_v33 }
 0x302   :  { %1196 = vmatpush.bf16.msrb.mxu2 %v2041_v36  ;;  %1209 = vmatpush.bf16.msrb.mxu3 %v2079_v48 }
 0x305   :  { %1171 = vmatpush.bf16.msrb.mxu0 %v2053_v40  ;;  %1184 = vmatpush.bf16.msrb.mxu1 %v2066_v44 }
 0x306   :  { %1197 = vmatpush.bf16.msrb.mxu2 %v2092_v52  ;;  %1210 = vmatpush.bf16.msrb.mxu3 %v2113_v59 }
 0x309   :  { %1172 = vmatpush.bf16.msrb.mxu0 %v2099_v54  ;;  %1185 = vmatpush.bf16.msrb.mxu1 %v2111_v58 }
 0x30a   :  { %1198 = vmatpush.bf16.msrb.mxu2 %v2134_v2  ;;  %1211 = vmatpush.bf16.msrb.mxu3 %v2146_v6 }
 0x30d   :  { %1173 = vmatpush.bf16.msrb.mxu0 %v2144_v5  ;;  %1186 = vmatpush.bf16.msrb.mxu1 %v2158_v10 }
 0x30e   :  { %1199 = vmatpush.bf16.msrb.mxu2 %v2170_v14  ;;  %1212 = vmatpush.bf16.msrb.mxu3 %v2176_v16 }
 0x311   :  { %1174 = vmatpush.bf16.msrb.mxu0 %v2174_v15  ;;  %1187 = vmatpush.bf16.msrb.mxu1 %v2182_v18 }
 0x312   :  { %1200 = vmatpush.bf16.msrb.mxu2 %v2200_v22  ;;  %1213 = vmatpush.bf16.msrb.mxu3 %v2206_v24 }
 0x315   :  { %1175 = vmatpush.bf16.msrb.mxu0 %v2218_v28  ;;  %1188 = vmatpush.bf16.msrb.mxu1 %v2230_v34 }
 0x316   :  { %1201 = vmatpush.bf16.msrb.mxu2 %v2232_v35  ;;  %1214 = vmatpush.bf16.msrb.mxu3 %v2244_v41 }
 0x319   :  { %1176 = vmatpush.bf16.msrb.mxu0 %v2256_v46  ;;  %1189 = vmatpush.bf16.msrb.mxu1 %v2258_v47 }
 0x31a   :  { %1202 = vmatpush.bf16.msrb.mxu2 %v2270_v53  ;;  %1215 = vmatpush.bf16.msrb.mxu3 %v2282_v60 }
 0x31d   :  { %1177 = vmatpush.bf16.msrb.mxu0 %v2294_v0  ;;  %1190 = vmatpush.bf16.msrb.mxu1 %v2306_v7 }
 0x31e   :  { %1203 = vmatpush.bf16.msrb.mxu2 %v2309_v8  ;;  %1216 = vmatpush.bf16.msrb.mxu3 %v2315_v12 }
 0x37c   :  { %v939_v29 = vpop.f32.mrf.mxu0  ;;  %v952_v31 = vpop.f32.mrf.mxu1 }
 0x37d   :  { %v982_v63 = vadd.f32 %v939_v29, %v2738_v45  ;;  %v983_v51 = vadd.f32 %v952_v31, %v2739_v17 }
 0x37f   :  { %v1686_v56 = vmul.f32 -1.442695, %v982_v63  ;;  %v1687_v38 = vmul.f32 -1.442695, %v983_v51 }
 0x381   :  { %1812 = vpow2.f32 %v1686_v56 }
 0x382   :  { %1814 = vpow2.f32 %v1687_v38 }
 0x383   :  { %v965_v4 = vpop.f32.mrf.mxu2  ;;  %v978_v26 = vpop.f32.mrf.mxu3 }
 0x384   :  { %v984_v49 = vadd.f32 %v965_v4, %v2740_v37  ;;  %v941_v21 = vpop.f32.mrf.mxu0  ;;  %v954_v43 = vpop.f32.mrf.mxu1  ;;  %v985_v62 = vadd.f32 %v978_v26, %v2741_v42 }
 0x386   :  { %v1688_v1 = vmul.f32 -1.442695, %v984_v49 }
 0x387   :  { %v1813_v23 = vpop.eup %1812 }
 0x388   :  { %v1815_v9 = vpop.eup %1814  ;;  %v995_v30 = vadd.f32 1.0, %v1813_v23  ;;  %1816 = vpow2.f32 %v1688_v1 }
 0x389   :  { %v996_v55 = vadd.f32 1.0, %v1815_v9 }
 0x38a   :  { %1818 = vrcp.f32 %v995_v30  ;;  %v1009_v29 = vand.u32 2147483648, %v995_v30  ;;  %v1007_v63 = vand.u32 2147483647, %v995_v30  ;;  %vm1003_vm3 = vweird.f32 %v995_v30 }
 0x38b   :  { %1820 = vrcp.f32 %v996_v55  ;;  %v967_v13 = vpop.f32.mrf.mxu2  ;;  %v980_v27 = vpop.f32.mrf.mxu3  ;;  %v1024_v31 = vand.u32 2147483648, %v996_v55  ;;  %v1022_v51 = vand.u32 2147483647, %v996_v55  ;;  %vm1018_vm4 = vweird.f32 %v996_v55 }
 0x38c   :  { %v1010_v26 = vor.u32 1.1754944e-38, %v1009_v29  ;;  %vm1008_vm7 = vcmp.eq.f32.partialorder %v1007_v63, 8.507059e+37 }
 0x38d   :  { %v1025_v49 = vor.u32 1.1754944e-38, %v1024_v31  ;;  %vm1023_vm8 = vcmp.eq.f32.partialorder %v1022_v51, 8.507059e+37 }
 0x38e   :  { %v1817_v19 = vpop.eup %1816 }
 0x38f   :  { %v997_v50 = vadd.f32 1.0, %v1817_v19 }
 0x390   :  { %v1819_v20 = vpop.eup %1818 }
 0x391   :  { %v1821_v11 = vpop.eup %1820  ;;  %v999_v25 = vmul.f32 %v1819_v20, %v995_v30  ;;  %1822 = vrcp.f32 %v997_v50  ;;  %vm1004_vm1 = vweird.f32 %v1819_v20  ;;  %vm1033_vm10 = vweird.f32 %v997_v50 }
 0x392   :  { %v1014_v39 = vmul.f32 %v1821_v11, %v996_v55  ;;  %1824 = vtanh.f32 %v985_v62  ;;  %vm1019_vm2 = vweird.f32 %v1821_v11  ;;  %vm1005_vm5 = vmor %vm1003_vm3, %vm1004_vm1  ;;  %v1039_v62 = vand.u32 2147483648, %v997_v50 }
 0x393   :  { %v1000_v57 = vsub.f32 1.0, %v999_v25  ;;  %vm1020_vm6 = vmor %vm1018_vm4, %vm1019_vm2 }
 0x394   :  { %v1015_v3 = vsub.f32 1.0, %v1014_v39  ;;  %v1040_v39 = vor.u32 1.1754944e-38, %v1039_v62 }
 0x395   :  { %v1001_v45 = vmul.f32 %v1819_v20, %v1000_v57 }
 0x396   :  { %v1016_v17 = vmul.f32 %v1821_v11, %v1015_v3 }
 0x397   :  { %v1823_v56 = vpop.eup %1822  ;;  %v1002_v38 = vadd.f32 %v1819_v20, %v1001_v45 }
 0x398   :  { %v1029_v4 = vmul.f32 %v1823_v56, %v997_v50  ;;  %v1017_v37 = vadd.f32 %v1821_v11, %v1016_v17  ;;  %v1825_v43 = vpop.eup %1824  ;;  %vm1034_vm9 = vweird.f32 %v1823_v56 }
 0x399   :  { %v1006_v21 = vsel %vm1005_vm5, %v1819_v20, %v1002_v38  ;;  %v1037_v20 = vand.u32 2147483647, %v997_v50  ;;  %vm1035_vm11 = vmor %vm1033_vm10, %vm1034_vm9 }
 0x39a   :  { %v1030_v1 = vsub.f32 1.0, %v1029_v4  ;;  %v1011_v23 = vsel %vm1008_vm7, %v1010_v26, %v1006_v21  ;;  %v1021_v9 = vsel %vm1020_vm6, %v1821_v11, %v1017_v37 }
 0x39b   :  { %v1026_v13 = vsel %vm1023_vm8, %v1025_v49, %v1021_v9  ;;  %v1045_v27 = vmul.f32 %v1825_v43, %v1011_v23  ;;  %vm1038_vm12 = vcmp.eq.f32.partialorder %v1037_v20, 8.507059e+37 }
 0x39c   :  { %v1044_v19 = vmul.f32 %v1026_v13, %v2591_v61  ;;  %v1031_v42 = vmul.f32 %v1823_v56, %v1030_v1 }
 0x39e   :  { %v2631_v30 = vadd.f32 %v1045_v27, %v1044_v19  ;;  %v1032_v55 = vadd.f32 %v1823_v56, %v1031_v42 }
 0x3a0   :  { %1826 = vtanh.f32 %v2631_v30  ;;  %v1036_v25 = vsel %vm1035_vm11, %v1823_v56, %v1032_v55 }
 0x3a1   :  { %v1041_v57 = vsel %vm1038_vm12, %v1040_v39, %v1036_v25 }
 0x3a6   :  { %v1827_v11 = vpop.eup %1826 }
 0x3a7   :  { %v1048_v3 = vmul.f32 %v1827_v11, %v1041_v57 }
 0x3a9   :  { %v1049_v29 = vpack.c.bf16 %v1048_v3, %v1048_v3 }
 0x3ab   :  { %1058 = vmatmul.bf16.vlgmr.msra.gmra.mxu0 %v1049_v29  ;;  %1071 = vmatmul.bf16.vlgmr.msra.gmra.mxu1 %v1049_v29 }
 0x3ac   :  { %1084 = vmatmul.bf16.vlgmr.msra.gmra.mxu2 %v1049_v29  ;;  %1097 = vmatmul.bf16.vlgmr.msra.gmra.mxu3 %v1049_v29 }
 0x3ad   :  { %1290 = vmatpush.bf16.msra.mxu0 %v2031_v32  ;;  %1303 = vmatpush.bf16.msra.mxu1 %v2033_v33 }
 0x3ae   :  { %1316 = vmatpush.bf16.msra.mxu2 %v2041_v36  ;;  %1329 = vmatpush.bf16.msra.mxu3 %v2079_v48  ;;  %v2742_v36 = vld [vmem:[#allocation18_spill] sm:$0xff] }
 0x3b1   :  { %1291 = vmatpush.bf16.msra.mxu0 %v2053_v40  ;;  %1304 = vmatpush.bf16.msra.mxu1 %v2066_v44  ;;  %v2743_v44 = vld [vmem:[#allocation19_spill] sm:$0xff] }
 0x3b2   :  { %1317 = vmatpush.bf16.msra.mxu2 %v2092_v52  ;;  %1330 = vmatpush.bf16.msra.mxu3 %v2113_v59 }
 0x3b5   :  { %1292 = vmatpush.bf16.msra.mxu0 %v2099_v54  ;;  %1305 = vmatpush.bf16.msra.mxu1 %v2111_v58 }
 0x3b6   :  { %1318 = vmatpush.bf16.msra.mxu2 %v2134_v2  ;;  %1331 = vmatpush.bf16.msra.mxu3 %v2146_v6  ;;  %v2744_v2 = vld [vmem:[#allocation20_spill] sm:$0xff] }
 0x3b9   :  { %1293 = vmatpush.bf16.msra.mxu0 %v2144_v5  ;;  %1306 = vmatpush.bf16.msra.mxu1 %v2158_v10 }
 0x3ba   :  { %1319 = vmatpush.bf16.msra.mxu2 %v2170_v14  ;;  %1332 = vmatpush.bf16.msra.mxu3 %v2176_v16 }
 0x3bd   :  { %1294 = vmatpush.bf16.msra.mxu0 %v2174_v15  ;;  %1307 = vmatpush.bf16.msra.mxu1 %v2182_v18 }
 0x3be   :  { %1320 = vmatpush.bf16.msra.mxu2 %v2200_v22  ;;  %1333 = vmatpush.bf16.msra.mxu3 %v2206_v24 }
 0x3c1   :  { %1295 = vmatpush.bf16.msra.mxu0 %v2218_v28  ;;  %1308 = vmatpush.bf16.msra.mxu1 %v2230_v34 }
 0x3c2   :  { %1321 = vmatpush.bf16.msra.mxu2 %v2232_v35  ;;  %1334 = vmatpush.bf16.msra.mxu3 %v2244_v41 }
 0x3c5   :  { %1296 = vmatpush.bf16.msra.mxu0 %v2256_v46  ;;  %1309 = vmatpush.bf16.msra.mxu1 %v2258_v47  ;;  %v2745_v46 = vld [vmem:[#allocation21_spill] sm:$0xff] }
 0x3c6   :  { %1322 = vmatpush.bf16.msra.mxu2 %v2270_v53  ;;  %1335 = vmatpush.bf16.msra.mxu3 %v2282_v60 }
 0x3c9   :  { %1297 = vmatpush.bf16.msra.mxu0 %v2294_v0  ;;  %1310 = vmatpush.bf16.msra.mxu1 %v2306_v7 }
 0x3ca   :  { %1323 = vmatpush.bf16.msra.mxu2 %v2309_v8  ;;  %1336 = vmatpush.bf16.msra.mxu3 %v2315_v12 }
 0x428   :  { %v1059_v32 = vpop.f32.mrf.mxu0  ;;  %v1072_v33 = vpop.f32.mrf.mxu1 }
 0x429   :  { %v1102_v40 = vadd.f32 %v1059_v32, %v2742_v36  ;;  %v1103_v48 = vadd.f32 %v1072_v33, %v2743_v44  ;;  %v2746_v32 = vld [vmem:[#allocation22_spill] sm:$0xff]  ;;  %v2747_v36 = vld [vmem:[#allocation23_spill] sm:$0xff] }
 0x42b   :  { %v1689_v52 = vmul.f32 -1.442695, %v1102_v40  ;;  %v1690_v54 = vmul.f32 -1.442695, %v1103_v48 }
 0x42d   :  { %1828 = vpow2.f32 %v1689_v52 }
 0x42e   :  { %1830 = vpow2.f32 %v1690_v54 }
 0x42f   :  { %v1085_v58 = vpop.f32.mrf.mxu2  ;;  %v1098_v59 = vpop.f32.mrf.mxu3 }
 0x430   :  { %v1104_v5 = vadd.f32 %v1085_v58, %v2744_v2  ;;  %v1061_v6 = vpop.f32.mrf.mxu0  ;;  %v1074_v10 = vpop.f32.mrf.mxu1  ;;  %v1105_v47 = vadd.f32 %v1098_v59, %v2745_v46  ;;  %v2748_v58 = vld [vmem:[#allocation24_spill] sm:$0xff] }
 0x432   :  { %v1691_v14 = vmul.f32 -1.442695, %v1104_v5 }
 0x433   :  { %v1829_v15 = vpop.eup %1828 }
 0x434   :  { %v1831_v16 = vpop.eup %1830  ;;  %v1115_v18 = vadd.f32 1.0, %v1829_v15  ;;  %1832 = vpow2.f32 %v1691_v14 }
 0x435   :  { %v1116_v22 = vadd.f32 1.0, %v1831_v16 }
 0x436   :  { %1834 = vrcp.f32 %v1115_v18  ;;  %v1129_v12 = vand.u32 2147483648, %v1115_v18  ;;  %v1127_v31 = vand.u32 2147483647, %v1115_v18  ;;  %vm1123_vm15 = vweird.f32 %v1115_v18 }
 0x437   :  { %1836 = vrcp.f32 %v1116_v22  ;;  %v1087_v24 = vpop.f32.mrf.mxu2  ;;  %v1100_v28 = vpop.f32.mrf.mxu3  ;;  %v1144_v61 = vand.u32 2147483648, %v1116_v22  ;;  %v1142_v63 = vand.u32 2147483647, %v1116_v22  ;;  %vm1138_vm0 = vweird.f32 %v1116_v22 }
 0x438   :  { %v1130_v38 = vor.u32 1.1754944e-38, %v1129_v12  ;;  %vm1128_vm3 = vcmp.eq.f32.partialorder %v1127_v31, 8.507059e+37 }
 0x439   :  { %v1145_v26 = vor.u32 1.1754944e-38, %v1144_v61  ;;  %vm1143_vm4 = vcmp.eq.f32.partialorder %v1142_v63, 8.507059e+37 }
 0x43a   :  { %v1833_v34 = vpop.eup %1832 }
 0x43b   :  { %v1117_v35 = vadd.f32 1.0, %v1833_v34 }
 0x43c   :  { %v1835_v41 = vpop.eup %1834 }
 0x43d   :  { %v1837_v53 = vpop.eup %1836  ;;  %v1119_v60 = vmul.f32 %v1835_v41, %v1115_v18  ;;  %1838 = vrcp.f32 %v1117_v35  ;;  %vm1124_vm13 = vweird.f32 %v1835_v41  ;;  %v1159_v55 = vand.u32 2147483648, %v1117_v35 }
 0x43e   :  { %v1134_v0 = vmul.f32 %v1837_v53, %v1116_v22  ;;  %1840 = vtanh.f32 %v1105_v47  ;;  %vm1139_vm14 = vweird.f32 %v1837_v53  ;;  %vm1125_vm1 = vmor %vm1123_vm15, %vm1124_vm13  ;;  %vm1153_vm6 = vweird.f32 %v1117_v35 }
 0x43f   :  { %v1120_v7 = vsub.f32 1.0, %v1119_v60  ;;  %vm1140_vm2 = vmor %vm1138_vm0, %vm1139_vm14  ;;  %v1157_v62 = vand.u32 2147483647, %v1117_v35  ;;  %v1160_v25 = vor.u32 1.1754944e-38, %v1159_v55 }
 0x440   :  { %v1135_v8 = vsub.f32 1.0, %v1134_v0 }
 0x441   :  { %v1121_v50 = vmul.f32 %v1835_v41, %v1120_v7  ;;  %vm1158_vm8 = vcmp.eq.f32.partialorder %v1157_v62, 8.507059e+37 }
 0x442   :  { %v1136_v45 = vmul.f32 %v1837_v53, %v1135_v8 }
 0x443   :  { %v1839_v17 = vpop.eup %1838  ;;  %v1122_v51 = vadd.f32 %v1835_v41, %v1121_v50 }
 0x444   :  { %v1149_v56 = vmul.f32 %v1839_v17, %v1117_v35  ;;  %v1137_v4 = vadd.f32 %v1837_v53, %v1136_v45  ;;  %v1841_v49 = vpop.eup %1840  ;;  %vm1154_vm5 = vweird.f32 %v1839_v17  ;;  %v2749_v35 = vld [vmem:[#allocation25_spill] sm:$0xff] }
 0x445   :  { %v1126_v37 = vsel %vm1125_vm1, %v1835_v41, %v1122_v51  ;;  %vm1155_vm7 = vmor %vm1153_vm6, %vm1154_vm5 }
 0x446   :  { %v1150_v21 = vsub.f32 1.0, %v1149_v56  ;;  %v1131_v43 = vsel %vm1128_vm3, %v1130_v38, %v1126_v37  ;;  %v1141_v1 = vsel %vm1140_vm2, %v1837_v53, %v1137_v4 }
 0x447   :  { %v1146_v23 = vsel %vm1143_vm4, %v1145_v26, %v1141_v1  ;;  %v1165_v9 = vmul.f32 %v1841_v49, %v1131_v43 }
 0x448   :  { %v1164_v13 = vmul.f32 %v1146_v23, %v2631_v30  ;;  %v1151_v27 = vmul.f32 %v1839_v17, %v1150_v21 }
 0x44a   :  { %v2671_v19 = vadd.f32 %v1165_v9, %v1164_v13  ;;  %v1152_v42 = vadd.f32 %v1839_v17, %v1151_v27 }
 0x44c   :  { %1842 = vtanh.f32 %v2671_v19  ;;  %v1156_v20 = vsel %vm1155_vm7, %v1839_v17, %v1152_v42 }
 0x44d   :  { %v1161_v11 = vsel %vm1158_vm8, %v1160_v25, %v1156_v20 }
 0x452   :  { %v1843_v39 = vpop.eup %1842 }
 0x453   :  { %v1168_v57 = vmul.f32 %v1843_v39, %v1161_v11 }
 0x455   :  { %v1169_v3 = vpack.c.bf16 %v1168_v57, %v1168_v57 }
 0x457   :  { %1178 = vmatmul.bf16.vlgmr.msrb.gmra.mxu0 %v1169_v3  ;;  %1191 = vmatmul.bf16.vlgmr.msrb.gmra.mxu1 %v1169_v3 }
 0x458   :  { %1204 = vmatmul.bf16.vlgmr.msrb.gmra.mxu2 %v1169_v3  ;;  %1217 = vmatmul.bf16.vlgmr.msrb.gmra.mxu3 %v1169_v3 }
 0x4d4   :  { %v1179_v30 = vpop.f32.mrf.mxu0  ;;  %v1192_v29 = vpop.f32.mrf.mxu1 }
 0x4d5   :  { %v1222_v33 = vadd.f32 %v1179_v30, %v2746_v32  ;;  %v1223_v40 = vadd.f32 %v1192_v29, %v2747_v36  ;;  %v2750_v30 = vld [vmem:[#allocation26_spill] sm:$0xff]  ;;  %v2751_v32 = vld [vmem:[#allocation27_spill] sm:$0xff] }
 0x4d7   :  { %v1692_v44 = vmul.f32 -1.442695, %v1222_v33  ;;  %v1693_v48 = vmul.f32 -1.442695, %v1223_v40 }
 0x4d9   :  { %1844 = vpow2.f32 %v1692_v44 }
 0x4da   :  { %1846 = vpow2.f32 %v1693_v48 }
 0x4db   :  { %v1205_v52 = vpop.f32.mrf.mxu2  ;;  %v1218_v54 = vpop.f32.mrf.mxu3 }
 0x4dc   :  { %v1224_v59 = vadd.f32 %v1205_v52, %v2748_v58  ;;  %v1181_v2 = vpop.f32.mrf.mxu0  ;;  %v1194_v5 = vpop.f32.mrf.mxu1  ;;  %v1225_v41 = vadd.f32 %v1218_v54, %v2749_v35  ;;  %v2752_v52 = vld [vmem:[#allocation28_spill] sm:$0xff] }
 0x4de   :  { %v1694_v6 = vmul.f32 -1.442695, %v1224_v59 }
 0x4df   :  { %v1845_v10 = vpop.eup %1844 }
 0x4e0   :  { %v1847_v14 = vpop.eup %1846  ;;  %v1235_v15 = vadd.f32 1.0, %v1845_v10  ;;  %1848 = vpow2.f32 %v1694_v6 }
 0x4e1   :  { %v1236_v16 = vadd.f32 1.0, %v1847_v14 }
 0x4e2   :  { %1850 = vrcp.f32 %v1235_v15  ;;  %v1249_v7 = vand.u32 2147483648, %v1235_v15  ;;  %v1247_v61 = vand.u32 2147483647, %v1235_v15  ;;  %vm1243_vm11 = vweird.f32 %v1235_v15 }
 0x4e3   :  { %1852 = vrcp.f32 %v1236_v16  ;;  %v1207_v18 = vpop.f32.mrf.mxu2  ;;  %v1220_v22 = vpop.f32.mrf.mxu3  ;;  %v1264_v8 = vand.u32 2147483648, %v1236_v16  ;;  %v1262_v31 = vand.u32 2147483647, %v1236_v16  ;;  %vm1258_vm12 = vweird.f32 %v1236_v16 }
 0x4e4   :  { %v1250_v51 = vor.u32 1.1754944e-38, %v1249_v7  ;;  %vm1248_vm15 = vcmp.eq.f32.partialorder %v1247_v61, 8.507059e+37  ;;  %v1421_v18 = vld [vmem:[#allocation2] sm:$0x1] }
 0x4e5   :  { %v1265_v38 = vor.u32 1.1754944e-38, %v1264_v8  ;;  %vm1263_vm0 = vcmp.eq.f32.partialorder %v1262_v31, 8.507059e+37  ;;  %1424 = vperm.xlu0 %1744, %v1421_v18  }
 0x4e6   :  { %v1849_v24 = vpop.eup %1848 }
 0x4e7   :  { %v1237_v28 = vadd.f32 1.0, %v1849_v24 }
 0x4e8   :  { %v1851_v34 = vpop.eup %1850 }
 0x4e9   :  { %v1853_v46 = vpop.eup %1852  ;;  %v1239_v47 = vmul.f32 %v1851_v34, %v1235_v15  ;;  %1854 = vrcp.f32 %v1237_v28  ;;  %vm1244_vm9 = vweird.f32 %v1851_v34  ;;  %v1279_v42 = vand.u32 2147483648, %v1237_v28 }
 0x4ea   :  { %v1254_v53 = vmul.f32 %v1853_v46, %v1236_v16  ;;  %1856 = vtanh.f32 %v1225_v41  ;;  %vm1259_vm10 = vweird.f32 %v1853_v46  ;;  %vm1245_vm13 = vmor %vm1243_vm11, %vm1244_vm9  ;;  %vm1273_vm2 = vweird.f32 %v1237_v28 }
 0x4eb   :  { %v1240_v60 = vsub.f32 1.0, %v1239_v47  ;;  %vm1260_vm14 = vmor %vm1258_vm12, %vm1259_vm10  ;;  %v1277_v55 = vand.u32 2147483647, %v1237_v28  ;;  %v1280_v20 = vor.u32 1.1754944e-38, %v1279_v42 }
 0x4ec   :  { %v1255_v0 = vsub.f32 1.0, %v1254_v53  ;;  %v1456_v53 = vld [vmem:[#allocation4] sm:$0x1] }
 0x4ed   :  { %v1241_v12 = vmul.f32 %v1851_v34, %v1240_v60  ;;  %vm1278_vm4 = vcmp.eq.f32.partialorder %v1277_v55, 8.507059e+37  ;;  %1459 = vperm.xlu1 %1745, %v1456_v53  }
 0x4ee   :  { %v1256_v50 = vmul.f32 %v1853_v46, %v1255_v0  ;;  %v1448_v0 = vld [vmem:[#allocation3] sm:$0x1] }
 0x4ef   :  { %v1855_v45 = vpop.eup %1854  ;;  %v1242_v63 = vadd.f32 %v1851_v34, %v1241_v12  ;;  %1451 = vperm.xlu0 %1744, %v1448_v0  }
 0x4f0   :  { %v1269_v17 = vmul.f32 %v1855_v45, %v1237_v28  ;;  %v1257_v56 = vadd.f32 %v1853_v46, %v1256_v50  ;;  %v1857_v26 = vpop.eup %1856  ;;  %vm1274_vm1 = vweird.f32 %v1855_v45 }
 0x4f1   :  { %v1246_v4 = vsel %vm1245_vm13, %v1851_v34, %v1242_v63  ;;  %vm1275_vm3 = vmor %vm1273_vm2, %vm1274_vm1  ;;  %v2753_v34 = vld [vmem:[#allocation29_spill] sm:$0xff]  ;;  %vm1464_vm1 = vcmask 57344  }
 0x4f2   :  { %v1270_v37 = vsub.f32 1.0, %v1269_v17  ;;  %v1251_v49 = vsel %vm1248_vm15, %v1250_v51, %v1246_v4  ;;  %v1261_v21 = vsel %vm1260_vm14, %v1853_v46, %v1257_v56 }
 0x4f3   :  { %v1266_v43 = vsel %vm1263_vm0, %v1265_v38, %v1261_v21  ;;  %v1285_v1 = vmul.f32 %v1857_v26, %v1251_v49 }
 0x4f4   :  { %v1284_v23 = vmul.f32 %v1266_v43, %v2671_v19  ;;  %v1271_v9 = vmul.f32 %v1855_v45, %v1270_v37 }
 0x4f6   :  { %v2679_v13 = vadd.f32 %v1285_v1, %v1284_v23  ;;  %v1272_v27 = vadd.f32 %v1855_v45, %v1271_v9 }
 0x4f8   :  { %1858 = vtanh.f32 %v2679_v13  ;;  %v1276_v62 = vsel %vm1275_vm3, %v1855_v45, %v1272_v27 }
 0x4f9   :  { %v1281_v39 = vsel %vm1278_vm4, %v1280_v20, %v1276_v62 }
 0x4fe   :  { %v1859_v25 = vpop.eup %1858 }
 0x4ff   :  { %v1288_v11 = vmul.f32 %v1859_v25, %v1281_v39 }
 0x501   :  { %v1289_v57 = vpack.c.bf16 %v1288_v11, %v1288_v11  ;;  %v1746_v11 = vld [vmem:[%s2703_s4] ss:$0 sm:$0xff]  ;;  %s1903_s4 = smov [#allocation5]  }
 0x502   :  { %s1471_s8 = sshll.u32 %s1903_s4, 4  ;;  %s1472_s8 = int_to_ptr.vmem [resolvable:$true] %s1471_s8 }
 0x503   :  { %1298 = vmatmul.bf16.vlgmr.msra.gmra.mxu0 %v1289_v57  ;;  %1311 = vmatmul.bf16.vlgmr.msra.gmra.mxu1 %v1289_v57 }
 0x504   :  { %1324 = vmatmul.bf16.vlgmr.msra.gmra.mxu2 %v1289_v57  ;;  %1337 = vmatmul.bf16.vlgmr.msra.gmra.mxu3 %v1289_v57 }
 0x580   :  { %v1299_v19 = vpop.f32.mrf.mxu0  ;;  %v1312_v3 = vpop.f32.mrf.mxu1 }
 0x581   :  { %v1342_v29 = vadd.f32 %v1299_v19, %v2750_v30  ;;  %v1343_v33 = vadd.f32 %v1312_v3, %v2751_v32 }
 0x583   :  { %v1695_v36 = vmul.f32 -1.442695, %v1342_v29  ;;  %v1696_v40 = vmul.f32 -1.442695, %v1343_v33  ;;  %v1420_v33 = vld [vmem:[%s2705_s6] sm:$0x1] }
 0x585   :  { %1860 = vpow2.f32 %v1695_v36  ;;  %v1425_v36 = vpop.permute.xlu0 %1424 }
 0x586   :  { %1862 = vpow2.f32 %v1696_v40 }
 0x587   :  { %v1325_v44 = vpop.f32.mrf.mxu2  ;;  %v1338_v48 = vpop.f32.mrf.mxu3 }
 0x588   :  { %v1344_v54 = vadd.f32 %v1325_v44, %v2752_v52  ;;  %v1301_v58 = vpop.f32.mrf.mxu0  ;;  %v1314_v59 = vpop.f32.mrf.mxu1  ;;  %v1345_v35 = vadd.f32 %v1338_v48, %v2753_v34  ;;  %v1427_v48 = vperm.slane %v1425_v36, 0 }
 0x589   :  { %v1460_v44 = vpop.permute.xlu1 %1459 }
 0x58a   :  { %v1697_v2 = vmul.f32 -1.442695, %v1344_v54  ;;  %v1462_v59 = vperm.slane %v1460_v44, 0 }
 0x58b   :  { %v1861_v5 = vpop.eup %1860 }
 0x58c   :  { %v1863_v6 = vpop.eup %1862  ;;  %v1355_v10 = vadd.f32 1.0, %v1861_v5  ;;  %1864 = vpow2.f32 %v1697_v2 }
 0x58d   :  { %v1356_v14 = vadd.f32 1.0, %v1863_v6  ;;  %v1452_v40 = vpop.permute.xlu0 %1451 }
 0x58e   :  { %1866 = vrcp.f32 %v1355_v10  ;;  %v1369_v8 = vand.u32 2147483648, %v1355_v10  ;;  %v1367_v50 = vand.u32 2147483647, %v1355_v10  ;;  %vm1363_vm7 = vweird.f32 %v1355_v10 }
 0x58f   :  { %1868 = vrcp.f32 %v1356_v14  ;;  %v1327_v15 = vpop.f32.mrf.mxu2  ;;  %v1340_v16 = vpop.f32.mrf.mxu3  ;;  %v1384_v12 = vand.u32 2147483648, %v1356_v14  ;;  %v1382_v45 = vand.u32 2147483647, %v1356_v14  ;;  %vm1378_vm8 = vweird.f32 %v1356_v14 }
 0x590   :  { %v1370_v56 = vor.u32 1.1754944e-38, %v1369_v8  ;;  %vm1368_vm11 = vcmp.eq.f32.partialorder %v1367_v50, 8.507059e+37  ;;  %v1454_v54 = vperm.slane %v1452_v40, 0 }
 0x591   :  { %v1385_v4 = vor.u32 1.1754944e-38, %v1384_v12  ;;  %vm1383_vm12 = vcmp.eq.f32.partialorder %v1382_v45, 8.507059e+37 }
 0x592   :  { %v1865_v22 = vpop.eup %1864 }
 0x593   :  { %v1357_v24 = vadd.f32 1.0, %v1865_v22 }
 0x594   :  { %v1867_v28 = vpop.eup %1866 }
 0x595   :  { %v1869_v41 = vpop.eup %1868  ;;  %v1359_v46 = vmul.f32 %v1867_v28, %v1355_v10  ;;  %1870 = vrcp.f32 %v1357_v24  ;;  %vm1364_vm5 = vweird.f32 %v1867_v28  ;;  %v1399_v62 = vand.u32 2147483648, %v1357_v24 }
 0x596   :  { %v1374_v47 = vmul.f32 %v1869_v41, %v1356_v14  ;;  %1872 = vtanh.f32 %v1345_v35  ;;  %vm1379_vm6 = vweird.f32 %v1869_v41  ;;  %vm1365_vm9 = vmor %vm1363_vm7, %vm1364_vm5  ;;  %vm1393_vm14 = vweird.f32 %v1357_v24 }
 0x597   :  { %v1360_v60 = vsub.f32 1.0, %v1359_v46  ;;  %vm1380_vm10 = vmor %vm1378_vm8, %vm1379_vm6  ;;  %v1397_v20 = vand.u32 2147483647, %v1357_v24  ;;  %v1400_v39 = vor.u32 1.1754944e-38, %v1399_v62 }
 0x598   :  { %v1375_v7 = vsub.f32 1.0, %v1374_v47 }
 0x599   :  { %v1361_v61 = vmul.f32 %v1867_v28, %v1360_v60  ;;  %vm1398_vm0 = vcmp.eq.f32.partialorder %v1397_v20, 8.507059e+37 }
 0x59a   :  { %v1376_v31 = vmul.f32 %v1869_v41, %v1375_v7 }
 0x59b   :  { %v1871_v63 = vpop.eup %1870  ;;  %v1362_v17 = vadd.f32 %v1867_v28, %v1361_v61 }
 0x59c   :  { %v1389_v51 = vmul.f32 %v1871_v63, %v1357_v24  ;;  %v1377_v38 = vadd.f32 %v1869_v41, %v1376_v31  ;;  %v1873_v37 = vpop.eup %1872  ;;  %vm1394_vm13 = vweird.f32 %v1871_v63 }
 0x59d   :  { %v1366_v26 = vsel %vm1365_vm9, %v1867_v28, %v1362_v17  ;;  %vm1395_vm15 = vmor %vm1393_vm14, %vm1394_vm13 }
 0x59e   :  { %v1390_v49 = vsub.f32 1.0, %v1389_v51  ;;  %v1371_v21 = vsel %vm1368_vm11, %v1370_v56, %v1366_v26  ;;  %v1381_v43 = vsel %vm1380_vm10, %v1869_v41, %v1377_v38 }
 0x59f   :  { %v1386_v1 = vsel %vm1383_vm12, %v1385_v4, %v1381_v43  ;;  %v1405_v23 = vmul.f32 %v1873_v37, %v1371_v21 }
 0x5a0   :  { %v1391_v9 = vmul.f32 %v1871_v63, %v1390_v49  ;;  %v1404_v27 = vmul.f32 %v1386_v1, %v2679_v13  ;;  %v1747_v13 = vld [vmem:[%s2704_s5] ss:$0 sm:$0xff] }
 0x5a2   :  { %v1406_v42 = vadd.f32 %v1405_v23, %v1404_v27  ;;  %v1392_v55 = vadd.f32 %v1871_v63, %v1391_v9 }
 0x5a4   :  { %1874 = vtanh.f32 %v1406_v42  ;;  %v1396_v25 = vsel %vm1395_vm15, %v1871_v63, %v1392_v55 }
 0x5a5   :  { %v1401_v19 = vsel %vm1398_vm0, %v1400_v39, %v1396_v25 }
 0x5aa   :  { %v1875_v57 = vpop.eup %1874 }
 0x5ab   :  { %v1408_v3 = vmul.f32 %v1875_v57, %v1401_v19 }
 0x5ad   :  { %v1413_v30 = vmul.f32 %v1746_v11, %v1408_v3 }
 0x5af   :  { %v1418_v29 = vadd.f32 %v1747_v13, %v1413_v30 }
 0x5b1   :  { %v1419_v32 = vmax.f32 %v1418_v29, 0.0 }
 0x5b3   :  { %1443 = vmatpush.xpose.msrb.mxu0 %v1419_v32 }
 0x5b6   :  { %1444 = vmatmul.f32.vlgmr.msrb.gmra.mxu0 %v1420_v33 }
 0x633   :  { %v1445_v52 = vpop.f32.mrf.mxu0 }
 0x634   :  { %v1446_v58 = vadd.f32 %v1445_v52, %v1427_v48 }
 0x636   :  { %v1455_v2 = vmul.f32 %v1454_v54, %v1446_v58 }
 0x638   :  { %v1463_v5 = vadd.f32 %v1462_v59, %v1455_v2 }
 0x63a   :  { %1465 = vst.msk [vmem:[#allocation5] sm:$0x1] %vm1464_vm1, %v1463_v5 }
 0x63b   :  { %1476 = dma.vmem_to_hbm [thread:$0]  %s1472_s8, 16, %s1474_s9, [#allocation6]  }
 0x63c   :  { %1900 = dma.done.wait [#allocation6], 16  }
 0x63d   :  { %1901 = vsyncadd [#allocation6], 4294967280 }
 0x63e   :  { %1481 = vsyncpa [#allocation6], 1 }

</bundles_post_ra>
